<compile_context>
chip_gen: v7x
topology: tpu7x:2x2x1
jax: 0.10.0
libtpu: 0.0.40
codegen_flags: <defaults>
</compile_context>

<pallas_src>
import functools

import jax
import jax.numpy as jnp
from jax.experimental import pallas as pl
from jax.experimental.pallas import tpu as pltpu

EPS_LN = 0.1        # LayerNorm eps from the module (eps=0.1)
NORM_CLAMP = 1e-8   # clamp for the row L2 norm
LANE = 128          # TPU lane width


def _round_up(x, m):
    return (x + m - 1) // m * m


def _swish(v):
    return v * jax.nn.sigmoid(v)


# ---------------------------------------------------------------------------
# Kernel
# ---------------------------------------------------------------------------
def encoder_kernel(
    x_ref,
    w1, b1, g1, be1,
    w2, b2, g2, be2,
    w3, b3, g3, be3,
    w4, b4, g4, be4,
    w5, b5, g5, be5,
    whead, bhead,
    out_ref,
    *, hidden_dim,
):
    x = x_ref[...].astype(jnp.float32)

    # norm = sqrt(sum(x^2, -1)).clamp(min=1e-8); x = x / norm[:, None]
    norm = jnp.maximum(jnp.sqrt(jnp.sum(x * x, axis=-1, keepdims=True)), NORM_CLAMP)
    x = x / norm

    # TODO(synk): F.dropout skipped (inference mode, training=False -> identity).

    hp = g1.shape[-1]                       # padded hidden width (multiple of 128)
    inv_h = 1.0 / float(hidden_dim)
    # Mask of the real hidden columns (padded columns are exactly zero
    # everywhere, but must be excluded from the LayerNorm statistics).
    col = jax.lax.broadcasted_iota(jnp.int32, (1, hp), 1)
    valid = (col < hidden_dim).astype(jnp.float32)

    def linear(v, w_ref, b_ref):
        return (
            jnp.dot(v, w_ref[...], preferred_element_type=jnp.float32)
            + b_ref[...]
        )

    def layernorm(v, gamma_ref, beta_ref):
        mean = jnp.sum(v, axis=-1, keepdims=True) * inv_h
        delta = (v - mean) * valid          # zero out padded columns
        var = jnp.sum(delta * delta, axis=-1, keepdims=True) * inv_h
        return delta * jax.lax.rsqrt(var + EPS_LN) * gamma_ref[...] + beta_ref[...]

    # Residual blocks with a running residual accumulator.
    h = layernorm(_swish(linear(x, w1, b1)), g1, be1)          # h1
    res = h
    h = layernorm(_swish(linear(h, w2, b2) + res), g2, be2)    # h2
    res = res + h
    h = layernorm(_swish(linear(h, w3, b3) + res), g3, be3)    # h3
    res = res + h
    h = layernorm(_swish(linear(h, w4, b4) + res), g4, be4)    # h4
    res = res + h
    h = layernorm(_swish(linear(h, w5, b5) + res), g5, be5)    # h5

    # Fused mu|logvar head, lane-dense (padded) output -> one unmasked store.
    out_ref[...] = linear(h, whead, bhead).astype(out_ref.dtype)


# ---------------------------------------------------------------------------
# Host-side packing / wrapper
# ---------------------------------------------------------------------------
def _pack_params(params, input_dim, hidden_dim, latent_dim):
    """Zero-pad hidden to 128 lanes and fuse mu|logvar head (lane-dense)."""
    hp = _round_up(hidden_dim, LANE)
    outp = _round_up(2 * latent_dim, LANE)

    def pad2(a, rows, cols):
        return jnp.pad(a, ((0, rows - a.shape[0]), (0, cols - a.shape[1])))

    packed = []
    for i in range(1, 6):
        in_rows = input_dim if i == 1 else hp
        packed.append(pad2(params[f"w{i}"], in_rows, hp))
        packed.append(pad2(params[f"b{i}"], 1, hp))
        packed.append(pad2(params[f"g{i}"], 1, hp))
        packed.append(pad2(params[f"be{i}"], 1, hp))

    w_head = jnp.concatenate([params["wmu"], params["wlv"]], axis=1)
    b_head = jnp.concatenate([params["bmu"], params["blv"]], axis=1)
    packed.append(pad2(w_head, hp, outp))
    packed.append(pad2(b_head, 1, outp))
    return packed, hp, outp


def _choose_tile_b(batch):
    bp = _round_up(max(batch, 1), 8)
    if bp <= 8:
        return 8
    # Prefer >= 2 grid steps (v7x megacore), cap tile rows at 512.
    half = _round_up((bp + 1) // 2, 8)
    return min(512, half)


def encoder_forward(x, params, *, tile_b=None):
    """Run the Encoder forward. x: [B, input_dim] float32. Returns (mu, logvar)."""
    B, input_dim = x.shape
    hidden_dim = params["w1"].shape[1]
    latent_dim = params["wmu"].shape[1]

    packed, hp, outp = _pack_params(params, input_dim, hidden_dim, latent_dim)

    if tile_b is None:
        tile_b = _choose_tile_b(B)
    tile_b = max(8, _round_up(tile_b, 8))
    bp = _round_up(B, tile_b)
    if bp != B:
        x = jnp.pad(x, ((0, bp - B), (0, 0)))
    nb = bp // tile_b

    def full_spec(arr):
        return pl.BlockSpec(arr.shape, lambda i: (0,) * arr.ndim)

    in_specs = [pl.BlockSpec((tile_b, input_dim), lambda i: (i, 0))]
    in_specs += [full_spec(p) for p in packed]
    out_specs = pl.BlockSpec((tile_b, outp), lambda i: (i, 0))
    out_shape = jax.ShapeDtypeStruct((bp, outp), jnp.float32)

    # Advisory cost estimate so XLA schedules around this small custom call.
    param_bytes = sum(int(p.size) for p in packed) * 4
    flops = int(2 * bp * (input_dim * hp + 4 * hp * hp + hp * outp) + 30 * bp * hp)
    transcendentals = int(6 * bp * hp)  # 5 sigmoids/elt + LN rsqrt
    bytes_accessed = int(4 * bp * input_dim + param_bytes + 4 * bp * outp)

    kernel = functools.partial(encoder_kernel, hidden_dim=hidden_dim)

    fn = pl.pallas_call(
        kernel,
        out_shape=out_shape,
        grid_spec=pltpu.PrefetchScalarGridSpec(
            num_scalar_prefetch=0,
            grid=(nb,),
            in_specs=in_specs,
            out_specs=out_specs,
        ),
        compiler_params=pltpu.CompilerParams(
            dimension_semantics=("parallel",),
        ),
        cost_estimate=pl.CostEstimate(
            flops=flops,
            transcendentals=transcendentals,
            bytes_accessed=bytes_accessed,
        ),
    )
    out = fn(x, *packed)            # [bp, outp] lane-dense slab
    out = out[:B]
    mu = out[:, :latent_dim]
    logvar = out[:, latent_dim:2 * latent_dim]
    return mu, logvar


# ---------------------------------------------------------------------------
# Params + pure-JAX reference
# ---------------------------------------------------------------------------
def init_params(key, input_dim, hidden_dim, latent_dim):
    """Deterministic synthetic parameter init (not a checkpoint load)."""
    params = {}
    ks = jax.random.split(key, 16)
    k_iter = iter(ks)

    def lin(k, fan_in, fan_out):
        scale = 1.0 / jnp.sqrt(fan_in)
        kw, kb = jax.random.split(k)
        w = jax.random.uniform(kw, (fan_in, fan_out), jnp.float32, -scale, scale)
        b = jax.random.uniform(kb, (1, fan_out), jnp.float32, -scale, scale)
        return w, b

    dims_in = [input_dim] + [hidden_dim] * 4
    for i in range(1, 6):
        w, b = lin(next(k_iter), dims_in[i - 1], hidden_dim)
        params[f"w{i}"] = w
        params[f"b{i}"] = b
        params[f"g{i}"] = jnp.ones((1, hidden_dim), jnp.float32)
        params[f"be{i}"] = jnp.zeros((1, hidden_dim), jnp.float32)

    params["wmu"], params["bmu"] = lin(next(k_iter), hidden_dim, latent_dim)
    params["wlv"], params["blv"] = lin(next(k_iter), hidden_dim, latent_dim)
    return params


def encoder_reference(x, params):
    """Pure-JAX reference of the same forward (for validation)."""
    norm = jnp.maximum(jnp.sqrt(jnp.sum(x * x, axis=-1, keepdims=True)), NORM_CLAMP)
    x = x / norm

    def lin(v, w, b):
        return v @ w + b

    def ln(v, g, be):
        mean = jnp.mean(v, axis=-1, keepdims=True)
        var = jnp.mean((v - mean) ** 2, axis=-1, keepdims=True)
        return (v - mean) * jax.lax.rsqrt(var + EPS_LN) * g + be

    hs = []
    v = x
    for i in range(1, 6):
        pre = lin(v, params[f"w{i}"], params[f"b{i}"])
        for hprev in hs:
            pre = pre + hprev
        hi = ln(_swish(pre), params[f"g{i}"], params[f"be{i}"])
        hs.append(hi)
        v = hi
    mu = lin(v, params["wmu"], params["bmu"])
    lv = lin(v, params["wlv"], params["blv"])
    return mu, lv


if __name__ == "__main__":
    B, input_dim, hidden_dim, latent_dim = 16, 32, 64, 16

    key = jax.random.PRNGKey(0)
    kx, kp = jax.random.split(key)
    x = jax.random.normal(kx, (B, input_dim), jnp.float32)
    params = init_params(kp, input_dim, hidden_dim, latent_dim)

    mu, logvar = encoder_forward(x, params)
    jax.block_until_ready((mu, logvar))

    mu_ref, lv_ref = encoder_reference(x, params)
    assert mu.shape == (B, latent_dim) and logvar.shape == (B, latent_dim)
    assert jnp.allclose(mu, mu_ref, atol=1e-4, rtol=1e-4)
    assert jnp.allclose(logvar, lv_ref, atol=1e-4, rtol=1e-4)

    print("KERNEL_OK")
</pallas_src>

<mosaic_0001>
module attributes {stable_mosaic.version = 11 : i64} {
  func.func @encoder_kernel(%arg0: i32, %arg1: memref<8x32xf32, #tpu.memory_space<vmem>>, %arg2: memref<32x128xf32, #tpu.memory_space<vmem>>, %arg3: memref<1x128xf32, #tpu.memory_space<vmem>>, %arg4: memref<1x128xf32, #tpu.memory_space<vmem>>, %arg5: memref<1x128xf32, #tpu.memory_space<vmem>>, %arg6: memref<128x128xf32, #tpu.memory_space<vmem>>, %arg7: memref<1x128xf32, #tpu.memory_space<vmem>>, %arg8: memref<1x128xf32, #tpu.memory_space<vmem>>, %arg9: memref<1x128xf32, #tpu.memory_space<vmem>>, %arg10: memref<128x128xf32, #tpu.memory_space<vmem>>, %arg11: memref<1x128xf32, #tpu.memory_space<vmem>>, %arg12: memref<1x128xf32, #tpu.memory_space<vmem>>, %arg13: memref<1x128xf32, #tpu.memory_space<vmem>>, %arg14: memref<128x128xf32, #tpu.memory_space<vmem>>, %arg15: memref<1x128xf32, #tpu.memory_space<vmem>>, %arg16: memref<1x128xf32, #tpu.memory_space<vmem>>, %arg17: memref<1x128xf32, #tpu.memory_space<vmem>>, %arg18: memref<128x128xf32, #tpu.memory_space<vmem>>, %arg19: memref<1x128xf32, #tpu.memory_space<vmem>>, %arg20: memref<1x128xf32, #tpu.memory_space<vmem>>, %arg21: memref<1x128xf32, #tpu.memory_space<vmem>>, %arg22: memref<128x128xf32, #tpu.memory_space<vmem>>, %arg23: memref<1x128xf32, #tpu.memory_space<vmem>>, %arg24: memref<8x128xf32, #tpu.memory_space<vmem>>) attributes {dimension_semantics = [#tpu.dimension_semantics<parallel>], iteration_bounds = array<i64: 2>, scalar_prefetch = 0 : i64, scratch_operands = 0 : i64, tpu.core_type = #tpu.core_type<tc>, window_params = [{transform_indices = @transform_0, window_bounds = array<i64: 8, 32>}, {pipeline_mode = #tpu.pipeline_mode<synchronous>, transform_indices = @transform_1, window_bounds = array<i64: 32, 128>}, {pipeline_mode = #tpu.pipeline_mode<synchronous>, transform_indices = @transform_2, window_bounds = array<i64: 1, 128>}, {pipeline_mode = #tpu.pipeline_mode<synchronous>, transform_indices = @transform_3, window_bounds = array<i64: 1, 128>}, {pipeline_mode = #tpu.pipeline_mode<synchronous>, transform_indices = @transform_4, window_bounds = array<i64: 1, 128>}, {pipeline_mode = #tpu.pipeline_mode<synchronous>, transform_indices = @transform_5, window_bounds = array<i64: 128, 128>}, {pipeline_mode = #tpu.pipeline_mode<synchronous>, transform_indices = @transform_6, window_bounds = array<i64: 1, 128>}, {pipeline_mode = #tpu.pipeline_mode<synchronous>, transform_indices = @transform_7, window_bounds = array<i64: 1, 128>}, {pipeline_mode = #tpu.pipeline_mode<synchronous>, transform_indices = @transform_8, window_bounds = array<i64: 1, 128>}, {pipeline_mode = #tpu.pipeline_mode<synchronous>, transform_indices = @transform_9, window_bounds = array<i64: 128, 128>}, {pipeline_mode = #tpu.pipeline_mode<synchronous>, transform_indices = @transform_10, window_bounds = array<i64: 1, 128>}, {pipeline_mode = #tpu.pipeline_mode<synchronous>, transform_indices = @transform_11, window_bounds = array<i64: 1, 128>}, {pipeline_mode = #tpu.pipeline_mode<synchronous>, transform_indices = @transform_12, window_bounds = array<i64: 1, 128>}, {pipeline_mode = #tpu.pipeline_mode<synchronous>, transform_indices = @transform_13, window_bounds = array<i64: 128, 128>}, {pipeline_mode = #tpu.pipeline_mode<synchronous>, transform_indices = @transform_14, window_bounds = array<i64: 1, 128>}, {pipeline_mode = #tpu.pipeline_mode<synchronous>, transform_indices = @transform_15, window_bounds = array<i64: 1, 128>}, {pipeline_mode = #tpu.pipeline_mode<synchronous>, transform_indices = @transform_16, window_bounds = array<i64: 1, 128>}, {pipeline_mode = #tpu.pipeline_mode<synchronous>, transform_indices = @transform_17, window_bounds = array<i64: 128, 128>}, {pipeline_mode = #tpu.pipeline_mode<synchronous>, transform_indices = @transform_18, window_bounds = array<i64: 1, 128>}, {pipeline_mode = #tpu.pipeline_mode<synchronous>, transform_indices = @transform_19, window_bounds = array<i64: 1, 128>}, {pipeline_mode = #tpu.pipeline_mode<synchronous>, transform_indices = @transform_20, window_bounds = array<i64: 1, 128>}, {pipeline_mode = #tpu.pipeline_mode<synchronous>, transform_indices = @transform_21, window_bounds = array<i64: 128, 128>}, {pipeline_mode = #tpu.pipeline_mode<synchronous>, transform_indices = @transform_22, window_bounds = array<i64: 1, 128>}, {transform_indices = @transform_23, window_bounds = array<i64: 8, 128>}]} {
    %c0 = arith.constant 0 : index
    %c0_0 = arith.constant 0 : index
    %0 = vector.load %arg1[%c0, %c0_0] : memref<8x32xf32, #tpu.memory_space<vmem>>, vector<8x32xf32>
    %1 = arith.mulf %0, %0 : vector<8x32xf32>
    %cst = arith.constant dense<0.000000e+00> : vector<8xf32>
    %2 = vector.multi_reduction <add>, %1, %cst [1] : vector<8x32xf32> to vector<8xf32>
    %3 = vector.shape_cast %2 : vector<8xf32> to vector<8x1xf32>
    %4 = math.sqrt %3 : vector<8x1xf32>
    %cst_1 = arith.constant 9.99999993E-9 : f32
    %5 = vector.broadcast %cst_1 : f32 to vector<8x1xf32>
    %6 = arith.maximumf %4, %5 : vector<8x1xf32>
    %7 = vector.broadcast %6 : vector<8x1xf32> to vector<8x32xf32>
    %8 = arith.divf %0, %7 : vector<8x32xf32>
    %9 = tpu.iota {dimensions = array<i32: 1>} : vector<1x128xi32>
    %c64_i32 = arith.constant 64 : i32
    %10 = vector.broadcast %c64_i32 : i32 to vector<1x128xi32>
    %11 = arith.cmpi slt, %9, %10 : vector<1x128xi32>
    %12 = arith.extui %11 : vector<1x128xi1> to vector<1x128xi32>
    %13 = arith.sitofp %12 : vector<1x128xi32> to vector<1x128xf32>
    %c0_2 = arith.constant 0 : index
    %c0_3 = arith.constant 0 : index
    %14 = vector.load %arg2[%c0_2, %c0_3] : memref<32x128xf32, #tpu.memory_space<vmem>>, vector<32x128xf32>
    %cst_4 = arith.constant dense<0.000000e+00> : vector<8x128xf32>
    %15 = tpu.matmul %8, %14, %cst_4 {dimension_numbers = #tpu.dot_dimension_numbers<[1], [0], [0], [1], [0, 0, 1, 1], [], []>} : vector<8x32xf32>, vector<32x128xf32>, vector<8x128xf32> -> vector<8x128xf32>
    %c0_5 = arith.constant 0 : index
    %c0_6 = arith.constant 0 : index
    %16 = vector.load %arg3[%c0_5, %c0_6] : memref<1x128xf32, #tpu.memory_space<vmem>>, vector<1x128xf32>
    %17 = vector.broadcast %16 : vector<1x128xf32> to vector<8x128xf32>
    %18 = arith.addf %15, %17 : vector<8x128xf32>
    %19 = arith.negf %18 : vector<8x128xf32>
    %20 = math.exp %19 : vector<8x128xf32>
    %cst_7 = arith.constant 1.000000e+00 : f32
    %21 = vector.broadcast %cst_7 : f32 to vector<8x128xf32>
    %22 = arith.addf %21, %20 : vector<8x128xf32>
    %23 = arith.divf %21, %22 : vector<8x128xf32>
    %24 = arith.mulf %18, %23 : vector<8x128xf32>
    %cst_8 = arith.constant dense<0.000000e+00> : vector<8xf32>
    %25 = vector.multi_reduction <add>, %24, %cst_8 [1] : vector<8x128xf32> to vector<8xf32>
    %26 = vector.shape_cast %25 : vector<8xf32> to vector<8x1xf32>
    %cst_9 = arith.constant 1.562500e-02 : f32
    %27 = vector.broadcast %cst_9 : f32 to vector<8x1xf32>
    %28 = arith.mulf %26, %27 : vector<8x1xf32>
    %29 = vector.broadcast %28 : vector<8x1xf32> to vector<8x128xf32>
    %30 = arith.subf %24, %29 : vector<8x128xf32>
    %31 = vector.broadcast %13 : vector<1x128xf32> to vector<8x128xf32>
    %32 = arith.mulf %30, %31 : vector<8x128xf32>
    %33 = arith.mulf %32, %32 : vector<8x128xf32>
    %cst_10 = arith.constant dense<0.000000e+00> : vector<8xf32>
    %34 = vector.multi_reduction <add>, %33, %cst_10 [1] : vector<8x128xf32> to vector<8xf32>
    %35 = vector.shape_cast %34 : vector<8xf32> to vector<8x1xf32>
    %cst_11 = arith.constant 1.562500e-02 : f32
    %36 = vector.broadcast %cst_11 : f32 to vector<8x1xf32>
    %37 = arith.mulf %35, %36 : vector<8x1xf32>
    %cst_12 = arith.constant 1.000000e-01 : f32
    %38 = vector.broadcast %cst_12 : f32 to vector<8x1xf32>
    %39 = arith.addf %37, %38 : vector<8x1xf32>
    %40 = math.rsqrt %39 : vector<8x1xf32>
    %41 = vector.broadcast %40 : vector<8x1xf32> to vector<8x128xf32>
    %42 = arith.mulf %32, %41 : vector<8x128xf32>
    %c0_13 = arith.constant 0 : index
    %c0_14 = arith.constant 0 : index
    %43 = vector.load %arg4[%c0_13, %c0_14] : memref<1x128xf32, #tpu.memory_space<vmem>>, vector<1x128xf32>
    %44 = vector.broadcast %43 : vector<1x128xf32> to vector<8x128xf32>
    %45 = arith.mulf %42, %44 : vector<8x128xf32>
    %c0_15 = arith.constant 0 : index
    %c0_16 = arith.constant 0 : index
    %46 = vector.load %arg5[%c0_15, %c0_16] : memref<1x128xf32, #tpu.memory_space<vmem>>, vector<1x128xf32>
    %47 = vector.broadcast %46 : vector<1x128xf32> to vector<8x128xf32>
    %48 = arith.addf %45, %47 : vector<8x128xf32>
    %c0_17 = arith.constant 0 : index
    %c0_18 = arith.constant 0 : index
    %49 = vector.load %arg6[%c0_17, %c0_18] : memref<128x128xf32, #tpu.memory_space<vmem>>, vector<128x128xf32>
    %cst_19 = arith.constant dense<0.000000e+00> : vector<8x128xf32>
    %50 = tpu.matmul %48, %49, %cst_19 {dimension_numbers = #tpu.dot_dimension_numbers<[1], [0], [0], [1], [0, 0, 1, 1], [], []>} : vector<8x128xf32>, vector<128x128xf32>, vector<8x128xf32> -> vector<8x128xf32>
    %c0_20 = arith.constant 0 : index
    %c0_21 = arith.constant 0 : index
    %51 = vector.load %arg7[%c0_20, %c0_21] : memref<1x128xf32, #tpu.memory_space<vmem>>, vector<1x128xf32>
    %52 = vector.broadcast %51 : vector<1x128xf32> to vector<8x128xf32>
    %53 = arith.addf %50, %52 : vector<8x128xf32>
    %54 = arith.addf %53, %48 : vector<8x128xf32>
    %55 = arith.negf %54 : vector<8x128xf32>
    %56 = math.exp %55 : vector<8x128xf32>
    %cst_22 = arith.constant 1.000000e+00 : f32
    %57 = vector.broadcast %cst_22 : f32 to vector<8x128xf32>
    %58 = arith.addf %57, %56 : vector<8x128xf32>
    %59 = arith.divf %57, %58 : vector<8x128xf32>
    %60 = arith.mulf %54, %59 : vector<8x128xf32>
    %cst_23 = arith.constant dense<0.000000e+00> : vector<8xf32>
    %61 = vector.multi_reduction <add>, %60, %cst_23 [1] : vector<8x128xf32> to vector<8xf32>
    %62 = vector.shape_cast %61 : vector<8xf32> to vector<8x1xf32>
    %cst_24 = arith.constant 1.562500e-02 : f32
    %63 = vector.broadcast %cst_24 : f32 to vector<8x1xf32>
    %64 = arith.mulf %62, %63 : vector<8x1xf32>
    %65 = vector.broadcast %64 : vector<8x1xf32> to vector<8x128xf32>
    %66 = arith.subf %60, %65 : vector<8x128xf32>
    %67 = vector.broadcast %13 : vector<1x128xf32> to vector<8x128xf32>
    %68 = arith.mulf %66, %67 : vector<8x128xf32>
    %69 = arith.mulf %68, %68 : vector<8x128xf32>
    %cst_25 = arith.constant dense<0.000000e+00> : vector<8xf32>
    %70 = vector.multi_reduction <add>, %69, %cst_25 [1] : vector<8x128xf32> to vector<8xf32>
    %71 = vector.shape_cast %70 : vector<8xf32> to vector<8x1xf32>
    %cst_26 = arith.constant 1.562500e-02 : f32
    %72 = vector.broadcast %cst_26 : f32 to vector<8x1xf32>
    %73 = arith.mulf %71, %72 : vector<8x1xf32>
    %cst_27 = arith.constant 1.000000e-01 : f32
    %74 = vector.broadcast %cst_27 : f32 to vector<8x1xf32>
    %75 = arith.addf %73, %74 : vector<8x1xf32>
    %76 = math.rsqrt %75 : vector<8x1xf32>
    %77 = vector.broadcast %76 : vector<8x1xf32> to vector<8x128xf32>
    %78 = arith.mulf %68, %77 : vector<8x128xf32>
    %c0_28 = arith.constant 0 : index
    %c0_29 = arith.constant 0 : index
    %79 = vector.load %arg8[%c0_28, %c0_29] : memref<1x128xf32, #tpu.memory_space<vmem>>, vector<1x128xf32>
    %80 = vector.broadcast %79 : vector<1x128xf32> to vector<8x128xf32>
    %81 = arith.mulf %78, %80 : vector<8x128xf32>
    %c0_30 = arith.constant 0 : index
    %c0_31 = arith.constant 0 : index
    %82 = vector.load %arg9[%c0_30, %c0_31] : memref<1x128xf32, #tpu.memory_space<vmem>>, vector<1x128xf32>
    %83 = vector.broadcast %82 : vector<1x128xf32> to vector<8x128xf32>
    %84 = arith.addf %81, %83 : vector<8x128xf32>
    %85 = arith.addf %48, %84 : vector<8x128xf32>
    %c0_32 = arith.constant 0 : index
    %c0_33 = arith.constant 0 : index
    %86 = vector.load %arg10[%c0_32, %c0_33] : memref<128x128xf32, #tpu.memory_space<vmem>>, vector<128x128xf32>
    %cst_34 = arith.constant dense<0.000000e+00> : vector<8x128xf32>
    %87 = tpu.matmul %84, %86, %cst_34 {dimension_numbers = #tpu.dot_dimension_numbers<[1], [0], [0], [1], [0, 0, 1, 1], [], []>} : vector<8x128xf32>, vector<128x128xf32>, vector<8x128xf32> -> vector<8x128xf32>
    %c0_35 = arith.constant 0 : index
    %c0_36 = arith.constant 0 : index
    %88 = vector.load %arg11[%c0_35, %c0_36] : memref<1x128xf32, #tpu.memory_space<vmem>>, vector<1x128xf32>
    %89 = vector.broadcast %88 : vector<1x128xf32> to vector<8x128xf32>
    %90 = arith.addf %87, %89 : vector<8x128xf32>
    %91 = arith.addf %90, %85 : vector<8x128xf32>
    %92 = arith.negf %91 : vector<8x128xf32>
    %93 = math.exp %92 : vector<8x128xf32>
    %cst_37 = arith.constant 1.000000e+00 : f32
    %94 = vector.broadcast %cst_37 : f32 to vector<8x128xf32>
    %95 = arith.addf %94, %93 : vector<8x128xf32>
    %96 = arith.divf %94, %95 : vector<8x128xf32>
    %97 = arith.mulf %91, %96 : vector<8x128xf32>
    %cst_38 = arith.constant dense<0.000000e+00> : vector<8xf32>
    %98 = vector.multi_reduction <add>, %97, %cst_38 [1] : vector<8x128xf32> to vector<8xf32>
    %99 = vector.shape_cast %98 : vector<8xf32> to vector<8x1xf32>
    %cst_39 = arith.constant 1.562500e-02 : f32
    %100 = vector.broadcast %cst_39 : f32 to vector<8x1xf32>
    %101 = arith.mulf %99, %100 : vector<8x1xf32>
    %102 = vector.broadcast %101 : vector<8x1xf32> to vector<8x128xf32>
    %103 = arith.subf %97, %102 : vector<8x128xf32>
    %104 = vector.broadcast %13 : vector<1x128xf32> to vector<8x128xf32>
    %105 = arith.mulf %103, %104 : vector<8x128xf32>
    %106 = arith.mulf %105, %105 : vector<8x128xf32>
    %cst_40 = arith.constant dense<0.000000e+00> : vector<8xf32>
    %107 = vector.multi_reduction <add>, %106, %cst_40 [1] : vector<8x128xf32> to vector<8xf32>
    %108 = vector.shape_cast %107 : vector<8xf32> to vector<8x1xf32>
    %cst_41 = arith.constant 1.562500e-02 : f32
    %109 = vector.broadcast %cst_41 : f32 to vector<8x1xf32>
    %110 = arith.mulf %108, %109 : vector<8x1xf32>
    %cst_42 = arith.constant 1.000000e-01 : f32
    %111 = vector.broadcast %cst_42 : f32 to vector<8x1xf32>
    %112 = arith.addf %110, %111 : vector<8x1xf32>
    %113 = math.rsqrt %112 : vector<8x1xf32>
    %114 = vector.broadcast %113 : vector<8x1xf32> to vector<8x128xf32>
    %115 = arith.mulf %105, %114 : vector<8x128xf32>
    %c0_43 = arith.constant 0 : index
    %c0_44 = arith.constant 0 : index
    %116 = vector.load %arg12[%c0_43, %c0_44] : memref<1x128xf32, #tpu.memory_space<vmem>>, vector<1x128xf32>
    %117 = vector.broadcast %116 : vector<1x128xf32> to vector<8x128xf32>
    %118 = arith.mulf %115, %117 : vector<8x128xf32>
    %c0_45 = arith.constant 0 : index
    %c0_46 = arith.constant 0 : index
    %119 = vector.load %arg13[%c0_45, %c0_46] : memref<1x128xf32, #tpu.memory_space<vmem>>, vector<1x128xf32>
    %120 = vector.broadcast %119 : vector<1x128xf32> to vector<8x128xf32>
    %121 = arith.addf %118, %120 : vector<8x128xf32>
    %122 = arith.addf %85, %121 : vector<8x128xf32>
    %c0_47 = arith.constant 0 : index
    %c0_48 = arith.constant 0 : index
    %123 = vector.load %arg14[%c0_47, %c0_48] : memref<128x128xf32, #tpu.memory_space<vmem>>, vector<128x128xf32>
    %cst_49 = arith.constant dense<0.000000e+00> : vector<8x128xf32>
    %124 = tpu.matmul %121, %123, %cst_49 {dimension_numbers = #tpu.dot_dimension_numbers<[1], [0], [0], [1], [0, 0, 1, 1], [], []>} : vector<8x128xf32>, vector<128x128xf32>, vector<8x128xf32> -> vector<8x128xf32>
    %c0_50 = arith.constant 0 : index
    %c0_51 = arith.constant 0 : index
    %125 = vector.load %arg15[%c0_50, %c0_51] : memref<1x128xf32, #tpu.memory_space<vmem>>, vector<1x128xf32>
    %126 = vector.broadcast %125 : vector<1x128xf32> to vector<8x128xf32>
    %127 = arith.addf %124, %126 : vector<8x128xf32>
    %128 = arith.addf %127, %122 : vector<8x128xf32>
    %129 = arith.negf %128 : vector<8x128xf32>
    %130 = math.exp %129 : vector<8x128xf32>
    %cst_52 = arith.constant 1.000000e+00 : f32
    %131 = vector.broadcast %cst_52 : f32 to vector<8x128xf32>
    %132 = arith.addf %131, %130 : vector<8x128xf32>
    %133 = arith.divf %131, %132 : vector<8x128xf32>
    %134 = arith.mulf %128, %133 : vector<8x128xf32>
    %cst_53 = arith.constant dense<0.000000e+00> : vector<8xf32>
    %135 = vector.multi_reduction <add>, %134, %cst_53 [1] : vector<8x128xf32> to vector<8xf32>
    %136 = vector.shape_cast %135 : vector<8xf32> to vector<8x1xf32>
    %cst_54 = arith.constant 1.562500e-02 : f32
    %137 = vector.broadcast %cst_54 : f32 to vector<8x1xf32>
    %138 = arith.mulf %136, %137 : vector<8x1xf32>
    %139 = vector.broadcast %138 : vector<8x1xf32> to vector<8x128xf32>
    %140 = arith.subf %134, %139 : vector<8x128xf32>
    %141 = vector.broadcast %13 : vector<1x128xf32> to vector<8x128xf32>
    %142 = arith.mulf %140, %141 : vector<8x128xf32>
    %143 = arith.mulf %142, %142 : vector<8x128xf32>
    %cst_55 = arith.constant dense<0.000000e+00> : vector<8xf32>
    %144 = vector.multi_reduction <add>, %143, %cst_55 [1] : vector<8x128xf32> to vector<8xf32>
    %145 = vector.shape_cast %144 : vector<8xf32> to vector<8x1xf32>
    %cst_56 = arith.constant 1.562500e-02 : f32
    %146 = vector.broadcast %cst_56 : f32 to vector<8x1xf32>
    %147 = arith.mulf %145, %146 : vector<8x1xf32>
    %cst_57 = arith.constant 1.000000e-01 : f32
    %148 = vector.broadcast %cst_57 : f32 to vector<8x1xf32>
    %149 = arith.addf %147, %148 : vector<8x1xf32>
    %150 = math.rsqrt %149 : vector<8x1xf32>
    %151 = vector.broadcast %150 : vector<8x1xf32> to vector<8x128xf32>
    %152 = arith.mulf %142, %151 : vector<8x128xf32>
    %c0_58 = arith.constant 0 : index
    %c0_59 = arith.constant 0 : index
    %153 = vector.load %arg16[%c0_58, %c0_59] : memref<1x128xf32, #tpu.memory_space<vmem>>, vector<1x128xf32>
    %154 = vector.broadcast %153 : vector<1x128xf32> to vector<8x128xf32>
    %155 = arith.mulf %152, %154 : vector<8x128xf32>
    %c0_60 = arith.constant 0 : index
    %c0_61 = arith.constant 0 : index
    %156 = vector.load %arg17[%c0_60, %c0_61] : memref<1x128xf32, #tpu.memory_space<vmem>>, vector<1x128xf32>
    %157 = vector.broadcast %156 : vector<1x128xf32> to vector<8x128xf32>
    %158 = arith.addf %155, %157 : vector<8x128xf32>
    %159 = arith.addf %122, %158 : vector<8x128xf32>
    %c0_62 = arith.constant 0 : index
    %c0_63 = arith.constant 0 : index
    %160 = vector.load %arg18[%c0_62, %c0_63] : memref<128x128xf32, #tpu.memory_space<vmem>>, vector<128x128xf32>
    %cst_64 = arith.constant dense<0.000000e+00> : vector<8x128xf32>
    %161 = tpu.matmul %158, %160, %cst_64 {dimension_numbers = #tpu.dot_dimension_numbers<[1], [0], [0], [1], [0, 0, 1, 1], [], []>} : vector<8x128xf32>, vector<128x128xf32>, vector<8x128xf32> -> vector<8x128xf32>
    %c0_65 = arith.constant 0 : index
    %c0_66 = arith.constant 0 : index
    %162 = vector.load %arg19[%c0_65, %c0_66] : memref<1x128xf32, #tpu.memory_space<vmem>>, vector<1x128xf32>
    %163 = vector.broadcast %162 : vector<1x128xf32> to vector<8x128xf32>
    %164 = arith.addf %161, %163 : vector<8x128xf32>
    %165 = arith.addf %164, %159 : vector<8x128xf32>
    %166 = arith.negf %165 : vector<8x128xf32>
    %167 = math.exp %166 : vector<8x128xf32>
    %cst_67 = arith.constant 1.000000e+00 : f32
    %168 = vector.broadcast %cst_67 : f32 to vector<8x128xf32>
    %169 = arith.addf %168, %167 : vector<8x128xf32>
    %170 = arith.divf %168, %169 : vector<8x128xf32>
    %171 = arith.mulf %165, %170 : vector<8x128xf32>
    %cst_68 = arith.constant dense<0.000000e+00> : vector<8xf32>
    %172 = vector.multi_reduction <add>, %171, %cst_68 [1] : vector<8x128xf32> to vector<8xf32>
    %173 = vector.shape_cast %172 : vector<8xf32> to vector<8x1xf32>
    %cst_69 = arith.constant 1.562500e-02 : f32
    %174 = vector.broadcast %cst_69 : f32 to vector<8x1xf32>
    %175 = arith.mulf %173, %174 : vector<8x1xf32>
    %176 = vector.broadcast %175 : vector<8x1xf32> to vector<8x128xf32>
    %177 = arith.subf %171, %176 : vector<8x128xf32>
    %178 = vector.broadcast %13 : vector<1x128xf32> to vector<8x128xf32>
    %179 = arith.mulf %177, %178 : vector<8x128xf32>
    %180 = arith.mulf %179, %179 : vector<8x128xf32>
    %cst_70 = arith.constant dense<0.000000e+00> : vector<8xf32>
    %181 = vector.multi_reduction <add>, %180, %cst_70 [1] : vector<8x128xf32> to vector<8xf32>
    %182 = vector.shape_cast %181 : vector<8xf32> to vector<8x1xf32>
    %cst_71 = arith.constant 1.562500e-02 : f32
    %183 = vector.broadcast %cst_71 : f32 to vector<8x1xf32>
    %184 = arith.mulf %182, %183 : vector<8x1xf32>
    %cst_72 = arith.constant 1.000000e-01 : f32
    %185 = vector.broadcast %cst_72 : f32 to vector<8x1xf32>
    %186 = arith.addf %184, %185 : vector<8x1xf32>
    %187 = math.rsqrt %186 : vector<8x1xf32>
    %188 = vector.broadcast %187 : vector<8x1xf32> to vector<8x128xf32>
    %189 = arith.mulf %179, %188 : vector<8x128xf32>
    %c0_73 = arith.constant 0 : index
    %c0_74 = arith.constant 0 : index
    %190 = vector.load %arg20[%c0_73, %c0_74] : memref<1x128xf32, #tpu.memory_space<vmem>>, vector<1x128xf32>
    %191 = vector.broadcast %190 : vector<1x128xf32> to vector<8x128xf32>
    %192 = arith.mulf %189, %191 : vector<8x128xf32>
    %c0_75 = arith.constant 0 : index
    %c0_76 = arith.constant 0 : index
    %193 = vector.load %arg21[%c0_75, %c0_76] : memref<1x128xf32, #tpu.memory_space<vmem>>, vector<1x128xf32>
    %194 = vector.broadcast %193 : vector<1x128xf32> to vector<8x128xf32>
    %195 = arith.addf %192, %194 : vector<8x128xf32>
    %c0_77 = arith.constant 0 : index
    %c0_78 = arith.constant 0 : index
    %196 = vector.load %arg22[%c0_77, %c0_78] : memref<128x128xf32, #tpu.memory_space<vmem>>, vector<128x128xf32>
    %cst_79 = arith.constant dense<0.000000e+00> : vector<8x128xf32>
    %197 = tpu.matmul %195, %196, %cst_79 {dimension_numbers = #tpu.dot_dimension_numbers<[1], [0], [0], [1], [0, 0, 1, 1], [], []>} : vector<8x128xf32>, vector<128x128xf32>, vector<8x128xf32> -> vector<8x128xf32>
    %c0_80 = arith.constant 0 : index
    %c0_81 = arith.constant 0 : index
    %198 = vector.load %arg23[%c0_80, %c0_81] : memref<1x128xf32, #tpu.memory_space<vmem>>, vector<1x128xf32>
    %199 = vector.broadcast %198 : vector<1x128xf32> to vector<8x128xf32>
    %200 = arith.addf %197, %199 : vector<8x128xf32>
    %c0_82 = arith.constant 0 : index
    %c0_83 = arith.constant 0 : index
    %201 = vector.load %arg24[%c0_82, %c0_83] : memref<8x128xf32, #tpu.memory_space<vmem>>, vector<8x128xf32>
    tpu.vector_store %arg24[%c0_82, %c0_83], %200 {strides = array<i32>} : memref<8x128xf32, #tpu.memory_space<vmem>>, vector<8x128xf32>,
    return
  }
  func.func @transform_0(%arg0: i32) -> (i32, i32) {
    %c0_i32 = arith.constant 0 : i32
    %c0_i32_0 = arith.constant 0 : i32
    return %arg0, %c0_i32 : i32, i32
  }
  func.func @transform_1(%arg0: i32) -> (i32, i32) {
    %c0_i32 = arith.constant 0 : i32
    %c0_i32_0 = arith.constant 0 : i32
    %c0_i32_1 = arith.constant 0 : i32
    return %c0_i32, %c0_i32_0 : i32, i32
  }
  func.func @transform_2(%arg0: i32) -> (i32, i32) {
    %c0_i32 = arith.constant 0 : i32
    %c0_i32_0 = arith.constant 0 : i32
    %c0_i32_1 = arith.constant 0 : i32
    return %c0_i32, %c0_i32_0 : i32, i32
  }
  func.func @transform_3(%arg0: i32) -> (i32, i32) {
    %c0_i32 = arith.constant 0 : i32
    %c0_i32_0 = arith.constant 0 : i32
    %c0_i32_1 = arith.constant 0 : i32
    return %c0_i32, %c0_i32_0 : i32, i32
  }
  func.func @transform_4(%arg0: i32) -> (i32, i32) {
    %c0_i32 = arith.constant 0 : i32
    %c0_i32_0 = arith.constant 0 : i32
    %c0_i32_1 = arith.constant 0 : i32
    return %c0_i32, %c0_i32_0 : i32, i32
  }
  func.func @transform_5(%arg0: i32) -> (i32, i32) {
    %c0_i32 = arith.constant 0 : i32
    %c0_i32_0 = arith.constant 0 : i32
    %c0_i32_1 = arith.constant 0 : i32
    return %c0_i32, %c0_i32_0 : i32, i32
  }
  func.func @transform_6(%arg0: i32) -> (i32, i32) {
    %c0_i32 = arith.constant 0 : i32
    %c0_i32_0 = arith.constant 0 : i32
    %c0_i32_1 = arith.constant 0 : i32
    return %c0_i32, %c0_i32_0 : i32, i32
  }
  func.func @transform_7(%arg0: i32) -> (i32, i32) {
    %c0_i32 = arith.constant 0 : i32
    %c0_i32_0 = arith.constant 0 : i32
    %c0_i32_1 = arith.constant 0 : i32
    return %c0_i32, %c0_i32_0 : i32, i32
  }
  func.func @transform_8(%arg0: i32) -> (i32, i32) {
    %c0_i32 = arith.constant 0 : i32
    %c0_i32_0 = arith.constant 0 : i32
    %c0_i32_1 = arith.constant 0 : i32
    return %c0_i32, %c0_i32_0 : i32, i32
  }
  func.func @transform_9(%arg0: i32) -> (i32, i32) {
    %c0_i32 = arith.constant 0 : i32
    %c0_i32_0 = arith.constant 0 : i32
    %c0_i32_1 = arith.constant 0 : i32
    return %c0_i32, %c0_i32_0 : i32, i32
  }
  func.func @transform_10(%arg0: i32) -> (i32, i32) {
    %c0_i32 = arith.constant 0 : i32
    %c0_i32_0 = arith.constant 0 : i32
    %c0_i32_1 = arith.constant 0 : i32
    return %c0_i32, %c0_i32_0 : i32, i32
  }
  func.func @transform_11(%arg0: i32) -> (i32, i32) {
    %c0_i32 = arith.constant 0 : i32
    %c0_i32_0 = arith.constant 0 : i32
    %c0_i32_1 = arith.constant 0 : i32
    return %c0_i32, %c0_i32_0 : i32, i32
  }
  func.func @transform_12(%arg0: i32) -> (i32, i32) {
    %c0_i32 = arith.constant 0 : i32
    %c0_i32_0 = arith.constant 0 : i32
    %c0_i32_1 = arith.constant 0 : i32
    return %c0_i32, %c0_i32_0 : i32, i32
  }
  func.func @transform_13(%arg0: i32) -> (i32, i32) {
    %c0_i32 = arith.constant 0 : i32
    %c0_i32_0 = arith.constant 0 : i32
    %c0_i32_1 = arith.constant 0 : i32
    return %c0_i32, %c0_i32_0 : i32, i32
  }
  func.func @transform_14(%arg0: i32) -> (i32, i32) {
    %c0_i32 = arith.constant 0 : i32
    %c0_i32_0 = arith.constant 0 : i32
    %c0_i32_1 = arith.constant 0 : i32
    return %c0_i32, %c0_i32_0 : i32, i32
  }
  func.func @transform_15(%arg0: i32) -> (i32, i32) {
    %c0_i32 = arith.constant 0 : i32
    %c0_i32_0 = arith.constant 0 : i32
    %c0_i32_1 = arith.constant 0 : i32
    return %c0_i32, %c0_i32_0 : i32, i32
  }
  func.func @transform_16(%arg0: i32) -> (i32, i32) {
    %c0_i32 = arith.constant 0 : i32
    %c0_i32_0 = arith.constant 0 : i32
    %c0_i32_1 = arith.constant 0 : i32
    return %c0_i32, %c0_i32_0 : i32, i32
  }
  func.func @transform_17(%arg0: i32) -> (i32, i32) {
    %c0_i32 = arith.constant 0 : i32
    %c0_i32_0 = arith.constant 0 : i32
    %c0_i32_1 = arith.constant 0 : i32
    return %c0_i32, %c0_i32_0 : i32, i32
  }
  func.func @transform_18(%arg0: i32) -> (i32, i32) {
    %c0_i32 = arith.constant 0 : i32
    %c0_i32_0 = arith.constant 0 : i32
    %c0_i32_1 = arith.constant 0 : i32
    return %c0_i32, %c0_i32_0 : i32, i32
  }
  func.func @transform_19(%arg0: i32) -> (i32, i32) {
    %c0_i32 = arith.constant 0 : i32
    %c0_i32_0 = arith.constant 0 : i32
    %c0_i32_1 = arith.constant 0 : i32
    return %c0_i32, %c0_i32_0 : i32, i32
  }
  func.func @transform_20(%arg0: i32) -> (i32, i32) {
    %c0_i32 = arith.constant 0 : i32
    %c0_i32_0 = arith.constant 0 : i32
    %c0_i32_1 = arith.constant 0 : i32
    return %c0_i32, %c0_i32_0 : i32, i32
  }
  func.func @transform_21(%arg0: i32) -> (i32, i32) {
    %c0_i32 = arith.constant 0 : i32
    %c0_i32_0 = arith.constant 0 : i32
    %c0_i32_1 = arith.constant 0 : i32
    return %c0_i32, %c0_i32_0 : i32, i32
  }
  func.func @transform_22(%arg0: i32) -> (i32, i32) {
    %c0_i32 = arith.constant 0 : i32
    %c0_i32_0 = arith.constant 0 : i32
    %c0_i32_1 = arith.constant 0 : i32
    return %c0_i32, %c0_i32_0 : i32, i32
  }
  func.func @transform_23(%arg0: i32) -> (i32, i32) {
    %c0_i32 = arith.constant 0 : i32
    %c0_i32_0 = arith.constant 0 : i32
    return %arg0, %c0_i32 : i32, i32
  }
}

</mosaic_0001>

<bundles_post_ra>
// kernel: tpu_custom_call.1
= control target key start
LH: loop header
LB: loop body
LE: loop exit
PB: predicated region body
PF: predicated region fallthrough
CT: control target
= control target key end

     0   :  { %s3180_s0 = inlined_call_operand.hbm [shape: f32[16,32], index: 0, kind: input, shape index: {}]   ;;  %s3181_s1 = inlined_call_operand.hbm [shape: f32[32,128], index: 1, kind: input, shape index: {}]   ;;  %s3182_s2 = inlined_call_operand.vmem [shape: f32[1,128], index: 2, kind: input, shape index: {}]   ;;  %s3183_s3 = inlined_call_operand.vmem [shape: f32[1,128], index: 3, kind: input, shape index: {}]   ;;  %s3184_s4 = inlined_call_operand.vmem [shape: f32[1,128], index: 4, kind: input, shape index: {}]   ;;  %s3185_s5 = inlined_call_operand.hbm [shape: f32[128,128], index: 5, kind: input, shape index: {}]   ;;  %s3186_s6 = inlined_call_operand.vmem [shape: f32[1,128], index: 6, kind: input, shape index: {}]   ;;  %s3187_s7 = inlined_call_operand.vmem [shape: f32[1,128], index: 7, kind: input, shape index: {}]   ;;  %s3188_s8 = inlined_call_operand.vmem [shape: f32[1,128], index: 8, kind: input, shape index: {}]   ;;  %s3189_s9 = inlined_call_operand.hbm [shape: f32[128,128], index: 9, kind: input, shape index: {}]   ;;  %s3190_s10 = inlined_call_operand.vmem [shape: f32[1,128], index: 10, kind: input, shape index: {}]   ;;  %s3191_s11 = inlined_call_operand.vmem [shape: f32[1,128], index: 11, kind: input, shape index: {}]   ;;  %s3192_s12 = inlined_call_operand.vmem [shape: f32[1,128], index: 12, kind: input, shape index: {}]   ;;  %s3193_s13 = inlined_call_operand.hbm [shape: f32[128,128], index: 13, kind: input, shape index: {}]   ;;  %s3194_s14 = inlined_call_operand.vmem [shape: f32[1,128], index: 14, kind: input, shape index: {}]   ;;  %s3195_s15 = inlined_call_operand.vmem [shape: f32[1,128], index: 15, kind: input, shape index: {}]   ;;  %s3196_s16 = inlined_call_operand.vmem [shape: f32[1,128], index: 16, kind: input, shape index: {}]   ;;  %s3197_s17 = inlined_call_operand.hbm [shape: f32[128,128], index: 17, kind: input, shape index: {}]   ;;  %s3198_s18 = inlined_call_operand.vmem [shape: f32[1,128], index: 18, kind: input, shape index: {}]   ;;  %s3199_s19 = inlined_call_operand.vmem [shape: f32[1,128], index: 19, kind: input, shape index: {}]   ;;  %s3200_s20 = inlined_call_operand.vmem [shape: f32[1,128], index: 20, kind: input, shape index: {}]   ;;  %s3201_s21 = inlined_call_operand.hbm [shape: f32[128,128], index: 21, kind: input, shape index: {}]   ;;  %s3202_s22 = inlined_call_operand.vmem [shape: f32[1,128], index: 22, kind: input, shape index: {}]   ;;  %s3203_s23 = inlined_call_operand.hbm [shape: f32[16,128], index: 23, kind: output, shape index: {}]  }
   0x1   :  { %3212 = sst [smem:[#allocation20_spill]] %s3180_s0 }
   0x2   :  { %3213 = sst [smem:[#allocation21_spill]] %s3181_s1 }
   0x3   :  { %3214 = sst [smem:[#allocation22_spill]] %s3182_s2 }
   0x4   :  { %3215 = sst [smem:[#allocation23_spill]] %s3183_s3 }
   0x5   :  { %3216 = sst [smem:[#allocation24_spill]] %s3184_s4 }
   0x6   :  { %3217 = sst [smem:[#allocation25_spill]] %s3185_s5 }
   0x7   :  { %3218 = sst [smem:[#allocation26_spill]] %s3186_s6 }
   0x8   :  { %3219 = sst [smem:[#allocation27_spill]] %s3187_s7 }
   0x9   :  { %3220 = sst [smem:[#allocation28_spill]] %s3189_s9 }
   0xa   :  { %3221 = sst [smem:[#allocation29_spill]] %s3193_s13 }
   0xb   :  { %3222 = sst [smem:[#allocation30_spill]] %s3194_s14 }
   0xc   :  { %3223 = sst [smem:[#allocation31_spill]] %s3195_s15 }
   0xd   :  { %3224 = sst [smem:[#allocation32_spill]] %s3196_s16 }
   0xe   :  { %3225 = sst [smem:[#allocation33_spill]] %s3198_s18 }
   0xf   :  { %3226 = sst [smem:[#allocation34_spill]] %s3199_s19 }
  0x10   :  { %3227 = sst [smem:[#allocation35_spill]] %s3200_s20 }
  0x11   :  { %3228 = sst [smem:[#allocation36_spill]] %s3202_s22 }
  0x12   :  { %3229 = sst [smem:[#allocation37_spill]] %s3203_s23 }
  0x13   :  { %28 = vsyncpa [#allocation3], 0 }
  0x14   :  { %30 = vsyncpa [#allocation3 + $0x1], 0 }
  0x15   :  { %31 = vsyncpa [#allocation6], 0 }
  0x16   :  { %32 = vsyncpa [#allocation9], 0 }
  0x17   :  { %33 = vsyncpa [#allocation12], 0 }
  0x18   :  { %34 = vsyncpa [#allocation4], 0 }
  0x19   :  { %36 = vsyncpa [#allocation4 + $0x1], 0  ;;  %s2713_s4 = smov 0   ;;  %s2715_s30 = smov 0  }
  0x1a   :  { %s2717_s24 = smov 0   ;;  %s2719_s25 = smov 0  }
  0x1b LB: > { %s2580_s5 = smov [#allocation5]   ;;  %s2734_s26 = sadd.s32 4294967295, %s2578_s25   ;;  %s2578_s25 = sphi %s2719_s25, %s3270_s25   ;;  %s2574_s24 = sphi %s2717_s24, %s3269_s24   ;;  %s2570_s30 = sphi %s2715_s30, %s3268_s30   ;;  %s2566_s4 = sphi %s2713_s4, %s3267_s4  }
  0x1c   : > { %s573_s1 = sshll.u32 %s2580_s5, 4  ;;  %p1708_p0 = scmp.ge.s32.totalorder %s2578_s25, 1  ;;  %s2739_s1 = int_to_ptr.vmem [resolvable:$true] %s573_s1 }
  0x1d   : > { %p3209_p1 = scmp.eq.s32.totalorder %s2734_s26, 0  ;;  %p561_p2 = scmp.lt.s32.totalorder %s2578_s25, 3 }
  0x1e   : > { %s2581_s6 = smov [#allocation8]   ;;  %s2582_s28 = smov [#allocation11]  }
  0x1f   : > { %p2741_p3 = pnand %p1708_p0, %p561_p2  ;;  %s617_s27 = sshll.u32 %s2581_s6, 4  ;;  %s2754_s27 = int_to_ptr.vmem [resolvable:$true] %s617_s27 }
  0x20   : > { %s661_s29 = sshll.u32 %s2582_s28, 4  ;;  %s3232_s5 = sld [smem:[#allocation21_spill]]  ;;  %s2756_s29 = int_to_ptr.vmem [resolvable:$true] %s661_s29 }
  0x21   : > { %s3230_s2 = scalar_select %p2741_p3, 1, 0 }
  0x22   : > { %p2184_p5 = pneg %p2741_p3 }
  0x24   : > { %p2750_p6 = pnand %p2184_p5, %p3209_p1 }
  0x26   : > { %s2302_s23 = scalar_lea.hbm %s3232_s5, 512  ;;  %p2766_p8 = pneg %p2750_p6 }
  0x27   : > { %p2303_p7 = scmp.ne.s32.totalorder %s3232_s5, %s2302_s23  ;;  %p2309_p11 = scmp.lt.u32.totalorder %s2302_s23, %s3232_s5 }
  0x29   : > { %p2305_p9 = pnand %p2766_p8, %p2303_p7 }
  0x2b   : > { %p2306_p10 = pneg %p2305_p9 }
  0x2d   : > { %p2311_p12 = pnand %p2309_p11, %p2306_p10 }
  0x2f   : > { %2314 = shalt.err (!%p2311_p12)
}
  0x30   : > { %s2315_s20 = scalar_lea.vmem %s2739_s1, 512  ;;  %p2323_p5 = scmp.lt.s32.totalorder %s2739_s1, %s2739_s1 }
  0x31   : > { %p2316_p13 = scmp.ne.s32.totalorder %s2739_s1, %s2315_s20  ;;  %p2324_p4 = scmp.lt.s32.totalorder %s2315_s20, %s2315_s20 }
  0x33   : > { %p2318_p0 = pnand %p2316_p13, %p2766_p8  ;;  %p2325_p7 = por %p2324_p4, %p2323_p5 }
  0x35   : > { %p2319_p2 = pneg %p2318_p0 }
  0x37   : > { %p2326_p9 = pnand %p2325_p7, %p2319_p2 }
  0x39   : > { %2329 = shalt.err (!%p2326_p9)
}
  0x3a   : > { %s2583_s22 = smov 128   ;;  %s2584_s19 = smov 8  }
  0x3b   : > { %2187 = dma.hbm_to_vmem [thread:$0]  (!%p2750_p6), %s3232_s5, 512, %s2739_s1, [#allocation6], %s2583_s22, %s2583_s22, %s2584_s19  }
  0x3c   : > { %s3234_s9 = sld [smem:[#allocation28_spill]] }
  0x42   : > { %s2330_s20 = scalar_lea.hbm %s3234_s9, 2048 }
  0x43   : > { %p2331_p4 = scmp.ne.s32.totalorder %s3234_s9, %s2330_s20  ;;  %p2337_p12 = scmp.lt.u32.totalorder %s2330_s20, %s3234_s9 }
  0x45   : > { %p2333_p10 = pnand %p2331_p4, %p2766_p8 }
  0x47   : > { %p2334_p11 = pneg %p2333_p10 }
  0x49   : > { %p2339_p13 = pnand %p2337_p12, %p2334_p11 }
  0x4b   : > { %2342 = shalt.err (!%p2339_p13)
}
  0x4c   : > { %s2343_s1 = scalar_lea.vmem %s2754_s27, 2048  ;;  %p2351_p7 = scmp.lt.s32.totalorder %s2754_s27, %s2754_s27 }
  0x4d   : > { %p2344_p0 = scmp.ne.s32.totalorder %s2754_s27, %s2343_s1  ;;  %p2352_p9 = scmp.lt.s32.totalorder %s2343_s1, %s2343_s1 }
  0x4f   : > { %p2346_p2 = pnand %p2344_p0, %p2766_p8  ;;  %p2353_p4 = por %p2352_p9, %p2351_p7 }
  0x51   : > { %p2347_p5 = pneg %p2346_p2 }
  0x53   : > { %p2354_p10 = pnand %p2353_p4, %p2347_p5 }
  0x55   : > { %2357 = shalt.err (!%p2354_p10)
}
  0x56   : > { %2193 = dma.hbm_to_vmem [thread:$0]  (!%p2750_p6), %s3234_s9, 2048, %s2754_s27, [#allocation9], %s2583_s22, %s2583_s22, %s2584_s19  }
  0x57   : > { %s2358_s23 = scalar_lea.hbm %s3197_s17, 2048 }
  0x58   : > { %p2359_p11 = scmp.ne.s32.totalorder %s3197_s17, %s2358_s23  ;;  %p2365_p0 = scmp.lt.u32.totalorder %s2358_s23, %s3197_s17 }
  0x5a   : > { %p2361_p12 = pnand %p2359_p11, %p2766_p8 }
  0x5c   : > { %p2362_p13 = pneg %p2361_p12 }
  0x5e   : > { %p2367_p2 = pnand %p2365_p0, %p2362_p13 }
  0x60   : > { %2370 = shalt.err (!%p2367_p2)
}
  0x61   : > { %s2371_s27 = scalar_lea.vmem %s2756_s29, 2048  ;;  %p2379_p4 = scmp.lt.s32.totalorder %s2756_s29, %s2756_s29 }
  0x62   : > { %p2372_p5 = scmp.ne.s32.totalorder %s2756_s29, %s2371_s27  ;;  %p2380_p10 = scmp.lt.s32.totalorder %s2371_s27, %s2371_s27 }
  0x64   : > { %p2374_p7 = pnand %p2372_p5, %p2766_p8  ;;  %p2381_p11 = por %p2380_p10, %p2379_p4 }
  0x66   : > { %p2375_p9 = pneg %p2374_p7 }
  0x68   : > { %p2382_p12 = pnand %p2381_p11, %p2375_p9 }
  0x6a   : > { %2385 = shalt.err (!%p2382_p12)
}
  0x6b   : > { %2199 = dma.hbm_to_vmem [thread:$0]  (!%p2750_p6), %s3197_s17, 2048, %s2756_s29, [#allocation12], %s2583_s22, %s2583_s22, %s2584_s19  }
  0x6c   : > { %s2585_s15 = smov [#allocation7]   ;;  %s2586_s18 = smov [#allocation10]  }
  0x6d   : > { %s595_s16 = sshll.u32 %s2585_s15, 4  ;;  %s639_s23 = sshll.u32 %s2586_s18, 4  ;;  %s596_s16 = int_to_ptr.vmem [resolvable:$true] %s595_s16  ;;  %s640_s23 = int_to_ptr.vmem [resolvable:$true] %s639_s23 }
  0x6e   : > { %s3235_s28 = sld [smem:[#allocation25_spill]] }
  0x74   : > { %s2386_s20 = scalar_lea.hbm %s3235_s28, 2048 }
  0x75   : > { %p2387_p13 = scmp.ne.s32.totalorder %s3235_s28, %s2386_s20  ;;  %p2393_p5 = scmp.lt.u32.totalorder %s2386_s20, %s3235_s28 }
  0x77   : > { %p2389_p0 = pnand %p2387_p13, %p2766_p8 }
  0x79   : > { %p2390_p2 = pneg %p2389_p0 }
  0x7b   : > { %p2395_p7 = pnand %p2393_p5, %p2390_p2 }
  0x7d   : > { %2398 = shalt.err (!%p2395_p7)
}
  0x7e   : > { %s2399_s29 = scalar_lea.vmem %s596_s16, 2048  ;;  %p2407_p11 = scmp.lt.s32.totalorder %s596_s16, %s596_s16 }
  0x7f   : > { %p2400_p9 = scmp.ne.s32.totalorder %s596_s16, %s2399_s29  ;;  %p2408_p12 = scmp.lt.s32.totalorder %s2399_s29, %s2399_s29 }
  0x81   : > { %p2402_p4 = pnand %p2400_p9, %p2766_p8  ;;  %p2409_p1 = por %p2408_p12, %p2407_p11 }
  0x83   : > { %p2403_p10 = pneg %p2402_p4 }
  0x85   : > { %p2410_p3 = pnand %p2409_p1, %p2403_p10 }
  0x87   : > { %2413 = shalt.err (!%p2410_p3)
}
  0x88   : > { %2190 = dma.hbm_to_vmem [thread:$0]  (!%p2750_p6), %s3235_s28, 2048, %s596_s16, [#allocation6], %s2583_s22, %s2583_s22, %s2584_s19  }
  0x89   : > { %s3236_s13 = sld [smem:[#allocation29_spill]] }
  0x8f   : > { %s2414_s18 = scalar_lea.hbm %s3236_s13, 2048 }
  0x90   : > { %p2415_p1 = scmp.ne.s32.totalorder %s3236_s13, %s2414_s18  ;;  %p2421_p0 = scmp.lt.u32.totalorder %s2414_s18, %s3236_s13 }
  0x92   : > { %p2417_p3 = pnand %p2415_p1, %p2766_p8 }
  0x94   : > { %p2418_p13 = pneg %p2417_p3 }
  0x96   : > { %p2423_p2 = pnand %p2421_p0, %p2418_p13 }
  0x98   : > { %2426 = shalt.err (!%p2423_p2)
}
  0x99   : > { %s2427_s1 = scalar_lea.vmem %s640_s23, 2048  ;;  %p2435_p4 = scmp.lt.s32.totalorder %s640_s23, %s640_s23 }
  0x9a   : > { %p2428_p5 = scmp.ne.s32.totalorder %s640_s23, %s2427_s1  ;;  %p2436_p10 = scmp.lt.s32.totalorder %s2427_s1, %s2427_s1 }
  0x9c   : > { %p2430_p7 = pnand %p2428_p5, %p2766_p8  ;;  %p2437_p11 = por %p2436_p10, %p2435_p4 }
  0x9e   : > { %p2431_p9 = pneg %p2430_p7 }
  0xa0   : > { %p2438_p12 = pnand %p2437_p11, %p2431_p9 }
  0xa2   : > { %2441 = shalt.err (!%p2438_p12)
}
  0xa3   : > { %2196 = dma.hbm_to_vmem [thread:$0]  (!%p2750_p6), %s3236_s13, 2048, %s640_s23, [#allocation9], %s2583_s22, %s2583_s22, %s2584_s19  }
  0xa4   : > { %s2587_s9 = smov [#allocation13]   ;;  %s2442_s18 = scalar_lea.hbm %s3201_s21, 2048 }
  0xa5   : > { %s683_s5 = sshll.u32 %s2587_s9, 4  ;;  %p2443_p1 = scmp.ne.s32.totalorder %s3201_s21, %s2442_s18  ;;  %s684_s5 = int_to_ptr.vmem [resolvable:$true] %s683_s5 }
  0xa6   : > { %p2449_p0 = scmp.lt.u32.totalorder %s2442_s18, %s3201_s21 }
  0xa7   : > { %p2445_p3 = pnand %p2443_p1, %p2766_p8 }
  0xa9   : > { %p2446_p13 = pneg %p2445_p3 }
  0xab   : > { %p2451_p2 = pnand %p2449_p0, %p2446_p13 }
  0xad   : > { %2454 = shalt.err (!%p2451_p2)
}
  0xae   : > { %s2455_s23 = scalar_lea.vmem %s684_s5, 2048  ;;  %p2463_p4 = scmp.lt.s32.totalorder %s684_s5, %s684_s5 }
  0xaf   : > { %p2456_p5 = scmp.ne.s32.totalorder %s684_s5, %s2455_s23  ;;  %p2464_p10 = scmp.lt.s32.totalorder %s2455_s23, %s2455_s23 }
  0xb1   : > { %p2458_p7 = pnand %p2456_p5, %p2766_p8  ;;  %p2465_p11 = por %p2464_p10, %p2463_p4 }
  0xb3   : > { %p2459_p9 = pneg %p2458_p7 }
  0xb5   : > { %p2466_p12 = pnand %p2465_p11, %p2459_p9 }
  0xb7   : > { %2469 = shalt.err (!%p2466_p12)
}
  0xb8   : > { %2202 = dma.hbm_to_vmem [thread:$0]  (!%p2750_p6), %s3201_s21, 2048, %s684_s5, [#allocation12], %s2583_s22, %s2583_s22, %s2584_s19  }
  0xb9   : > { %s1707_s7 = sadd.s32 4294967294, %s2578_s25   ;;  %s2907_s6 = sadd.s32 1, %s2578_s25  }
  0xba   : > { %s46_s29 = ssub.s32 %s2578_s25, %s2907_s6  ;;  %s49_s9 = sadd.s32 1, %s2574_s24 }
  0xbb   : > { %p47_p8 = scmp.eq.s32.totalorder %s46_s29, 0  ;;  %p56_p1 = scmp.ne.s32.totalorder %s2574_s24, %s2570_s30 }
  0xbc   : > { %p57_p3 = scmp.eq.s32.totalorder %s2578_s25, 0  ;;  %p62_p13 = scmp.ne.s32.totalorder %s2570_s30, %s2566_s4 }
  0xbd   : > { %s2918_s14 = scalar_select %p47_p8, %s2574_s24, %s49_s9  }
  0xbe   : > { %p2920_p0 = por %p57_p3, %p56_p1  ;;  %p3238_p2 = scmp.eq.s32.totalorder %s2734_s26, 0 }
  0xbf   : > { %p548_p5 = scmp.eq.s32.totalorder %s2734_s26, 1  ;;  %p554_p7 = scmp.eq.s32.totalorder %s1707_s7, 1 }
  0xc0   : > { %p2926_p6 = por %p3238_p2, %p62_p13  ;;  %p2217_p9 = scmp.lt.s32.totalorder %s2578_s25, 2 }
  0xc1   : > { %s700_s19 = sand.u32 1, %s2574_s24   ;;  %p2933_p4 = por %p548_p5, %p56_p1 }
  0xc2   : > { %p2937_p10 = por %p554_p7, %p62_p13  ;;  %s1716_s3 = sshll.u32 %s700_s19, 3 }
  0xc3   : > { %s3240_s5 = scalar_select %p2933_p4, 1, 0 }
  0xc4   : > { %s3241_s18 = scalar_select %p2937_p10, 1, 0 }
  0xc5   : > { %s1717_s0 = sshll.u32 %s2578_s25, 7  ;;  %s3242_s23 = sld [smem:[#allocation20_spill]] }
  0xc6   : > { %s704_s16 = scalar_lea.vmem [#allocation2], %s1716_s3  ;;  %p2951_p11 = pnand %p2217_p9, %p2920_p0 }
  0xc7   : > { %s711_s7 = sshll.u32 %s704_s16, 4  ;;  %s701_s9 = scalar_lea.sflag [#allocation3], %s700_s19  ;;  %s2947_s7 = int_to_ptr.vmem [resolvable:$true] %s711_s7 }
  0xc8   : > { %p2472_p8 = pneg %p2951_p11 }
  0xcb   : > { %s2945_s1 = scalar_lea.hbm %s3242_s23, %s1717_s0  ;;  %s2475_s20 = scalar_lea.hbm %s3242_s23, 256 }
  0xcc   : > { %s2470_s13 = scalar_lea.hbm %s2945_s1, 128  ;;  %p2476_p13 = scmp.lt.u32.totalorder %s2945_s1, %s3242_s23 }
  0xcd   : > { %p2471_p12 = scmp.ne.s32.totalorder %s2945_s1, %s2470_s13  ;;  %p2477_p0 = scmp.lt.u32.totalorder %s2475_s20, %s2470_s13 }
  0xce   : > { %p2479_p5 = scmp.lt.u32.totalorder %s2470_s13, %s2945_s1 }
  0xcf   : > { %p2473_p1 = pnand %p2472_p8, %p2471_p12  ;;  %p2478_p2 = por %p2477_p0, %p2476_p13 }
  0xd1   : > { %p2474_p3 = pneg %p2473_p1  ;;  %p2480_p7 = por %p2479_p5, %p2478_p2 }
  0xd3   : > { %p2481_p9 = pnand %p2480_p7, %p2474_p3 }
  0xd5   : > { %2484 = shalt.err (!%p2481_p9)
}
  0xd6   : > { %s2485_s19 = scalar_lea.vmem %s2947_s7, 128  ;;  %s2588_s16 = smov [#allocation2]  }
  0xd7   : > { %p2486_p12 = scmp.ne.s32.totalorder %s2947_s7, %s2485_s19  ;;  %s2490_s3 = sshll.u32 %s2588_s16, 4  ;;  %s2491_s3 = int_to_ptr.vmem [resolvable:$false] %s2490_s3 }
  0xd8   : > { %s2492_s0 = scalar_lea.vmem %s2491_s3, 256  ;;  %p2493_p4 = scmp.lt.s32.totalorder %s2947_s7, %s2491_s3 }
  0xd9   : > { %p2488_p1 = pnand %p2486_p12, %p2472_p8  ;;  %p2494_p13 = scmp.lt.s32.totalorder %s2492_s0, %s2485_s19 }
  0xdb   : > { %p2489_p10 = pneg %p2488_p1  ;;  %p2495_p0 = por %p2494_p13, %p2493_p4 }
  0xdd   : > { %p2496_p2 = pnand %p2495_p0, %p2489_p10 }
  0xdf   : > { %2499 = shalt.err (!%p2496_p2)
}
  0xe0   : > { %2206 = dma.hbm_to_vmem [thread:$0]  (!%p2951_p11), %s2945_s1, 128, %s2947_s7, %s701_s9  }
  0xe1   : > { %p3244_p3 = scmp.ne.s32.totalorder %s3230_s2, 0 }
  0xe2   : > { %s2983_s13 = sand.u32 (!%p3244_p3), 1, %s2570_s30  }
  0xe3   : > { %720 = sbr.rel (%p3244_p3) target bundleno = 3431 (0xd67), region = 112  ;;  %s1719_s20 = sshll.u32 (!%p3244_p3), %s2983_s13, 3 }
  0xe4   : > { %s723_s15 = scalar_lea.sflag (!%p3244_p3), [#allocation3], %s2983_s13  ;;  %s726_s27 = scalar_lea.vmem (!%p3244_p3), [#allocation2], %s1719_s20 }
  0xea   : > { %2545 = dma.done.wait (%p2926_p6), %s723_s15, 128  }
  0xeb   : > { %2547 = vsyncadd (%p2926_p6), %s723_s15, 4294967168  ;;  %p3245_p4 = scmp.eq.s32.totalorder %s2734_s26, 0 }
  0xed   : > { %2549 = dma.done.wait (%p3245_p4), [#allocation6], 2560   ;;  %p3246_p10 = pmov %p3245_p4 }
  0xee   : > { %p3247_p11 = pmov %p3245_p4 }
  0xef   : > { %2551 = vsyncadd (%p3246_p10), [#allocation6], 4294964736 }
  0xf0   : > { %2553 = dma.done.wait (%p3247_p11), [#allocation9], 4096   ;;  %p3248_p8 = pmov %p3245_p4 }
  0xf1   : > { %p3249_p5 = pmov %p3245_p4 }
  0xf2   : > { %2555 = vsyncadd (%p3248_p8), [#allocation9], 4294963200 }
  0xf3   : > { %2557 = dma.done.wait (%p3249_p5), [#allocation12], 4096   ;;  %p3250_p7 = pmov %p3245_p4 }
  0xf4   : > { %v813_v0 = vld [vmem:[%s726_s27] sm:$0xff]  ;;  %vm815_vm0 = vcmask 261120   ;;  %v834_v3 = vld [vmem:[#allocation5] sm:$0xff]  ;;  %v835_v4 = vld [vmem:[#allocation5 + $0x8] sm:$0xff]  ;;  %v2589_v6 = vmov 0.0|0.0   ;;  %vm2590_vm1 = vmmov 0   ;;  %v829_v38 = vlaneseq }
  0xf5   : > { %2559 = vsyncadd (%p3250_p7), [#allocation12], 4294963200  ;;  %v814_v1 = vmul.f32 %v813_v0, %v813_v0  ;;  %v836_v5 = vld [vmem:[#allocation5 + $0x10] sm:$0xff]  ;;  %2030 = vmatprep.subr.bf16.mxu0 %v2589_v6  ;;  %v2031_v7 = vpack.c.bf16 %v835_v4, %v834_v3  ;;  %v837_v8 = vld [vmem:[#allocation5 + $0x18] sm:$0xff]  ;;  %v2591_v9 = vmov 0.0   ;;  %2036 = vmatprep.subr.bf16.mxu1 %v2589_v6  ;;  %s3251_s1 = sld [smem:[#allocation22_spill]] }
  0xf6   : > { %1852 = vmatprep.mubr.msk.f32.mxu0 %vm2590_vm1, %v2591_v9  ;;  %1887 = vmatprep.mubr.msk.f32.mxu1 %vm2590_vm1, %v2591_v9  ;;  %v2034_v10 = vpack.c.bf16 %v837_v8, %v836_v5  ;;  %v953_v29 = vld [vmem:[#allocation7] sm:$0xff]  ;;  %v954_v30 = vld [vmem:[#allocation7 + $0x8] sm:$0xff]  ;;  %v955_v31 = vld [vmem:[#allocation7 + $0x10] sm:$0xff]  ;;  %v830_v39 = vand.u32 127, %v829_v38  ;;  %s3252_s9 = sld [smem:[#allocation23_spill]]  ;;  %s3253_s3 = sld [smem:[#allocation24_spill]] }
  0xf7   : > { %v816_v2 = vsel %vm815_vm0, %v814_v1, 0.0  ;;  %2032 = vmatpush3.bf16.msra.mxu0 %v2031_v7  ;;  %v2037_v32 = vpack.c.bf16 %v954_v30, %v953_v29  ;;  %v956_v33 = vld [vmem:[#allocation7 + $0x18] sm:$0xff]  ;;  %v957_v35 = vld [vmem:[#allocation7 + $0x20] sm:$0xff]  ;;  %v958_v36 = vld [vmem:[#allocation7 + $0x28] sm:$0xff]  ;;  %s3254_s27 = sld [smem:[#allocation26_spill]]  ;;  %s3256_s22 = sld [smem:[#allocation30_spill]] }
  0xf8   : > { %817 = vadd.xlane.f32.xlu0 %v816_v2  ;;  %2033 = vmatprep.subr.bf16.mxu0 %v2589_v6  ;;  %v2040_v34 = vpack.c.bf16 %v956_v33, %v955_v31  ;;  %v2043_v37 = vpack.c.bf16 %v958_v36, %v957_v35  ;;  %vm831_vm4 = vcmp.lt.s32.totalorder %v830_v39, 64  ;;  %v959_v46 = vld [vmem:[#allocation7 + $0x30] sm:$0xff]  ;;  %v960_v47 = vld [vmem:[#allocation7 + $0x38] sm:$0xff]  ;;  %v961_v49 = vld [vmem:[#allocation7 + $0x40] sm:$0xff]  ;;  %s3257_s29 = sld [smem:[#allocation31_spill]]  ;;  %s3258_s16 = sld [smem:[#allocation32_spill]] }
  0xf9   : > { %2038 = vmatpush3.bf16.msra.mxu1 %v2037_v32  ;;  %v3024_v42 = vsel %vm831_vm4, 1.0, %v2591_v9  ;;  %v2046_v48 = vpack.c.bf16 %v960_v47, %v959_v46  ;;  %v962_v50 = vld [vmem:[#allocation7 + $0x48] sm:$0xff]  ;;  %v963_v52 = vld [vmem:[#allocation7 + $0x50] sm:$0xff]  ;;  %v964_v53 = vld [vmem:[#allocation7 + $0x58] sm:$0xff]  ;;  %s3259_s15 = sld [smem:[#allocation33_spill]]  ;;  %s812_s0 = scalar_lea.vmem [#allocation14], %s1719_s20 }
  0xfa   : > { %2039 = vmatprep.subr.bf16.mxu1 %v2589_v6  ;;  %v2049_v51 = vpack.c.bf16 %v962_v50, %v961_v49  ;;  %v2052_v54 = vpack.c.bf16 %v964_v53, %v963_v52  ;;  %v965_v55 = vld [vmem:[#allocation7 + $0x60] sm:$0xff]  ;;  %v966_v56 = vld [vmem:[#allocation7 + $0x68] sm:$0xff]  ;;  %v967_v58 = vld [vmem:[#allocation7 + $0x70] sm:$0xff]  ;;  %s1567_s7 = scalar_lea.sflag [#allocation4], %s2983_s13  ;;  %p3264_p9 = scmp.ne.s32.totalorder %s3240_s5, 0 }
  0xfb   : > { %2035 = vmatpush3.bf16.msra.mxu0 %v2034_v10  ;;  %v1728_v20 = vld [vmem:[%s3251_s1] ss:$0 sm:$0xff]  ;;  %v2055_v57 = vpack.c.bf16 %v966_v56, %v965_v55  ;;  %v968_v59 = vld [vmem:[#allocation7 + $0x78] sm:$0xff]  ;;  %v1091_v35 = vld [vmem:[#allocation8 + $0x40] sm:$0xff]  ;;  %s3255_s1 = sld [smem:[#allocation27_spill]] }
  0xfc   : > { %2060 = vmatprep.subr.bf16.mxu0 %v2589_v6  ;;  %v2058_v60 = vpack.c.bf16 %v968_v59, %v967_v58  ;;  %v1731_v1 = vld [vmem:[%s3252_s9] ss:$0 sm:$0xff]  ;;  %v1090_v33 = vld [vmem:[#allocation8 + $0x38] sm:$0xff]  ;;  %v1092_v36 = vld [vmem:[#allocation8 + $0x48] sm:$0xff] }
  0xfd   : > { %2041 = vmatpush3.bf16.msra.mxu1 %v2040_v34  ;;  %v1732_v3 = vld [vmem:[%s3253_s3] ss:$0 sm:$0xff]  ;;  %v1094_v39 = vld [vmem:[#allocation8 + $0x58] sm:$0xff]  ;;  %s1751_s3 = sshll.u32 %s2734_s26, 7  ;;  %s2592_s26 = smov [#allocation14]  }
  0xfe   : > { %2042 = vmatprep.subr.bf16.mxu1 %v2589_v6  ;;  %v1733_v7 = vld [vmem:[%s3254_s27] ss:$0 sm:$0xff]  ;;  %v1098_v46 = vld [vmem:[#allocation8 + $0x78] sm:$0xff]  ;;  %s2504_s20 = sshll.u32 %s2592_s26, 4  ;;  %s2505_s20 = int_to_ptr.vmem [resolvable:$false] %s2504_s20 }
  0xff   : > { %v1089_v32 = vld [vmem:[#allocation8 + $0x30] sm:$0xff]  ;;  %s2506_s9 = scalar_lea.vmem %s2505_s20, 256 }
 0x100   : > { %v2070_v34 = vpack.c.bf16 %v1090_v33, %v1089_v32  ;;  %v1093_v38 = vld [vmem:[#allocation8 + $0x50] sm:$0xff]  ;;  %v1228_v33 = vld [vmem:[#allocation10 + $0x78] sm:$0xff] }
 0x101   : > { %2044 = vmatpush3.bf16.msra.mxu1 %v2043_v37  ;;  %v2073_v37 = vpack.c.bf16 %v1092_v36, %v1091_v35  ;;  %v1735_v52 = vld [vmem:[%s3255_s1] ss:$0 sm:$0xff] }
 0x102   : > { %2045 = vmatprep.subr.bf16.mxu1 %v2589_v6  ;;  %v1227_v32 = vld [vmem:[#allocation10 + $0x70] sm:$0xff] }
 0x105   : > { %2047 = vmatpush3.bf16.msra.mxu1 %v2046_v48 }
 0x106   : > { %2048 = vmatprep.subr.bf16.mxu1 %v2589_v6 }
 0x109   : > { %2050 = vmatpush3.bf16.msra.mxu1 %v2049_v51 }
 0x10a   : > { %2051 = vmatprep.subr.bf16.mxu1 %v2589_v6 }
 0x10d   : > { %2053 = vmatpush3.bf16.msra.mxu1 %v2052_v54  ;;  %v1736_v54 = vld [vmem:[%s3188_s8] ss:$0 sm:$0xff] }
 0x10e   : > { %2054 = vmatprep.subr.bf16.mxu1 %v2589_v6 }
 0x111   : > { %2056 = vmatpush3.bf16.msra.mxu1 %v2055_v57  ;;  %v1737_v57 = vld [vmem:[%s3190_s10] ss:$0 sm:$0xff] }
 0x112   : > { %2057 = vmatprep.subr.bf16.mxu1 %v2589_v6 }
 0x115   : > { %2059 = vmatpush3.bf16.msra.mxu1 %v2058_v60 }
 0x116   : > { %2084 = vmatprep.subr.bf16.mxu1 %v2589_v6 }
 0x185   : > { %v818_v11 = vpop.xlane.xlu0 %817 }
 0x186   : > { %2268 = vrsqrt.f32 %v818_v11  ;;  %vm821_vm2 = vcmp.eq.f32.partialorder %v818_v11, inf  ;;  %v824_v14 = vand.u32 2147483648, %v818_v11  ;;  %vm823_vm3 = vcmp.eq.f32.partialorder %v818_v11, 0.0 }
 0x190   : > { %v2269_v12 = vpop.eup %2268 }
 0x191   : > { %v820_v13 = vmul.f32 %v2269_v12, %v818_v11 }
 0x193   : > { %v822_v15 = vsel %vm821_vm2, %v818_v11, %v820_v13 }
 0x194   : > { %v825_v16 = vsel %vm823_vm3, %v824_v14, %v822_v15 }
 0x195   : > { %v826_v17 = vmax.f32 %v825_v16, 1e-08 }
 0x197   : > { %2270 = vrcp.f32 %v826_v17 }
 0x1a1   : > { %v2271_v18 = vpop.eup %2270 }
 0x1a2   : > { %v828_v19 = vmul.f32 %v2271_v18, %v813_v0  ;;  %v1083_v18 = vld [vmem:[#allocation8] sm:$0xff] }
 0x1a4   : > { %1853 = vmatmul.mubr.msk.f32.vlgmr.msra.gmra.mrb[0].mxu0 %vm815_vm0, %v828_v19  ;;  %v1084_v19 = vld [vmem:[#allocation8 + $0x8] sm:$0xff] }
 0x1a5   : > { %1922 = vmatprep.mubr.msk.f32.mxu0 %vm2590_vm1, %v2591_v9 }
 0x277   : > { %v914_v21 = vpop.f32.mrb[0].mxu0 }
 0x278   : > { %v915_v22 = vadd.f32 %v1728_v20, %v914_v21  ;;  %v1854_v23 = vpop.f32.mrb[1].mxu0  ;;  %v1085_v20 = vld [vmem:[#allocation8 + $0x10] sm:$0xff]  ;;  %v2061_v21 = vpack.c.bf16 %v1084_v19, %v1083_v18 }
 0x27a   : > { %v1730_v24 = vmul.f32 -1.442695, %v915_v22  ;;  %2062 = vmatpush3.bf16.msra.mxu0 %v2061_v21  ;;  %v1220_v21 = vld [vmem:[#allocation10 + $0x38] sm:$0xff] }
 0x27b   : > { %2063 = vmatprep.subr.bf16.mxu0 %v2589_v6 }
 0x27c   : > { %2272 = vpow2.f32 %v1730_v24  ;;  %v1087_v24 = vld [vmem:[#allocation8 + $0x20] sm:$0xff] }
 0x286   : > { %v2273_v25 = vpop.eup %2272 }
 0x287   : > { %v921_v26 = vadd.f32 1.0, %v2273_v25  ;;  %v1088_v25 = vld [vmem:[#allocation8 + $0x28] sm:$0xff] }
 0x289   : > { %2274 = vrcp.f32 %v921_v26  ;;  %v2067_v26 = vpack.c.bf16 %v1088_v25, %v1087_v24  ;;  %v1222_v24 = vld [vmem:[#allocation10 + $0x48] sm:$0xff] }
 0x293   : > { %v2275_v27 = vpop.eup %2274 }
 0x294   : > { %v924_v28 = vmul.f32 %v2275_v27, %v915_v22  ;;  %v1086_v22 = vld [vmem:[#allocation8 + $0x18] sm:$0xff] }
 0x295   : > { %v2064_v23 = vpack.c.bf16 %v1086_v22, %v1085_v20  ;;  %v1219_v20 = vld [vmem:[#allocation10 + $0x30] sm:$0xff] }
 0x296   : > { %925 = vadd.xlane.f32.xlu0 %v924_v28  ;;  %v2094_v22 = vpack.c.bf16 %v1220_v21, %v1219_v20  ;;  %v1358_v20 = vld [vmem:[#allocation11 + $0x78] sm:$0xff] }
 0x297   : > { %2065 = vmatpush3.bf16.msra.mxu0 %v2064_v23  ;;  %v1221_v23 = vld [vmem:[#allocation10 + $0x40] sm:$0xff] }
 0x298   : > { %2066 = vmatprep.subr.bf16.mxu0 %v2589_v6  ;;  %v2097_v25 = vpack.c.bf16 %v1222_v24, %v1221_v23 }
 0x29b   : > { %2068 = vmatpush3.bf16.msra.mxu0 %v2067_v26  ;;  %v1223_v26 = vld [vmem:[#allocation10 + $0x50] sm:$0xff] }
 0x29c   : > { %2069 = vmatprep.subr.bf16.mxu0 %v2589_v6 }
 0x29f   : > { %2071 = vmatpush3.bf16.msra.mxu0 %v2070_v34  ;;  %v2106_v34 = vpack.c.bf16 %v1228_v33, %v1227_v32 }
 0x2a0   : > { %2072 = vmatprep.subr.bf16.mxu0 %v2589_v6 }
 0x2a3   : > { %2074 = vmatpush3.bf16.msra.mxu0 %v2073_v37 }
 0x2a4   : > { %2075 = vmatprep.subr.bf16.mxu0 %v2589_v6 }
 0x323   : > { %v926_v40 = vpop.xlane.xlu0 %925 }
 0x324   : > { %v927_v41 = vmul.f32 0.015625, %v926_v40  ;;  %v2076_v40 = vpack.c.bf16 %v1094_v39, %v1093_v38  ;;  %v1739_v39 = vld [vmem:[%s3191_s11] ss:$0 sm:$0xff] }
 0x326   : > { %v928_v43 = vsub.f32 %v924_v28, %v927_v41  ;;  %v1095_v41 = vld [vmem:[#allocation8 + $0x60] sm:$0xff]  ;;  %2077 = vmatpush3.bf16.msra.mxu0 %v2076_v40 }
 0x327   : > { %2078 = vmatprep.subr.bf16.mxu0 %v2589_v6 }
 0x328   : > { %v929_v44 = vmul.f32 %v3024_v42, %v928_v43  ;;  %v1096_v43 = vld [vmem:[#allocation8 + $0x68] sm:$0xff] }
 0x32a   : > { %v930_v45 = vmul.f32 %v929_v44, %v929_v44 }
 0x32c   : > { %931 = vadd.xlane.f32.xlu1 %v930_v45  ;;  %v1097_v45 = vld [vmem:[#allocation8 + $0x70] sm:$0xff] }
 0x32d   : > { %v2082_v47 = vpack.c.bf16 %v1098_v46, %v1097_v45  ;;  %v1741_v45 = vld [vmem:[%s3256_s22] ss:$0 sm:$0xff]  ;;  %s3260_s22 = sld [smem:[#allocation34_spill]] }
 0x3b9   : > { %v932_v61 = vpop.xlane.xlu1 %931 }
 0x3ba   : > { %v933_v62 = vmul.f32 0.015625, %v932_v61 }
 0x3bc   : > { %v934_v63 = vadd.f32 0.1, %v933_v62 }
 0x3be   : > { %2276 = vrsqrt.f32 %v934_v63 }
 0x3c8   : > { %v2277_v0 = vpop.eup %2276 }
 0x3c9   : > { %v936_v2 = vmul.f32 %v2277_v0, %v929_v44  ;;  %v2079_v44 = vpack.c.bf16 %v1096_v43, %v1095_v41  ;;  %v1740_v41 = vld [vmem:[%s3192_s12] ss:$0 sm:$0xff] }
 0x3cb   : > { %v944_v4 = vmul.f32 %v1731_v1, %v936_v2  ;;  %2080 = vmatpush3.bf16.msra.mxu0 %v2079_v44 }
 0x3cc   : > { %2081 = vmatprep.subr.bf16.mxu0 %v2589_v6 }
 0x3cd   : > { %v3038_v5 = vadd.f32 %v1732_v3, %v944_v4  ;;  %v1213_v4 = vld [vmem:[#allocation10] sm:$0xff] }
 0x3cf   : > { %1888 = vmatmul.mubr.f32.vlgmr.msra.gmra.mrb[0].mxu1 %v3038_v5  ;;  %2083 = vmatpush3.bf16.msra.mxu0 %v2082_v47 }
 0x3d0   : > { %1957 = vmatprep.mubr.msk.f32.mxu1 %vm2590_vm1, %v2591_v9  ;;  %2108 = vmatprep.subr.bf16.mxu0 %v2589_v6 }
 0x4a2   : > { %v1042_v8 = vpop.f32.mrb[0].mxu1 }
 0x4a3   : > { %v1043_v10 = vadd.f32 %v1733_v7, %v1042_v8  ;;  %v1889_v11 = vpop.f32.mrb[1].mxu1  ;;  %v1214_v7 = vld [vmem:[#allocation10 + $0x8] sm:$0xff]  ;;  %v1215_v8 = vld [vmem:[#allocation10 + $0x10] sm:$0xff] }
 0x4a4   : > { %v1216_v11 = vld [vmem:[#allocation10 + $0x18] sm:$0xff] }
 0x4a5   : > { %v1046_v12 = vadd.f32 %v1043_v10, %v3038_v5  ;;  %v2085_v10 = vpack.c.bf16 %v1214_v7, %v1213_v4  ;;  %v1349_v7 = vld [vmem:[#allocation11 + $0x30] sm:$0xff] }
 0x4a7   : > { %v1734_v13 = vmul.f32 -1.442695, %v1046_v12  ;;  %2086 = vmatpush3.bf16.msra.mxu1 %v2085_v10 }
 0x4a8   : > { %2087 = vmatprep.subr.bf16.mxu1 %v2589_v6 }
 0x4a9   : > { %2278 = vpow2.f32 %v1734_v13  ;;  %v1218_v13 = vld [vmem:[#allocation10 + $0x28] sm:$0xff] }
 0x4b3   : > { %v2279_v14 = vpop.eup %2278 }
 0x4b4   : > { %v1050_v15 = vadd.f32 1.0, %v2279_v14 }
 0x4b6   : > { %2280 = vrcp.f32 %v1050_v15 }
 0x4c0   : > { %v2281_v16 = vpop.eup %2280 }
 0x4c1   : > { %v1053_v17 = vmul.f32 %v2281_v16, %v1046_v12  ;;  %v1217_v12 = vld [vmem:[#allocation10 + $0x20] sm:$0xff] }
 0x4c2   : > { %v2091_v14 = vpack.c.bf16 %v1218_v13, %v1217_v12  ;;  %v1353_v13 = vld [vmem:[#allocation11 + $0x50] sm:$0xff] }
 0x4c3   : > { %1054 = vadd.xlane.f32.xlu1 %v1053_v17 }
 0x550   : > { %v1055_v27 = vpop.xlane.xlu1 %1054 }
 0x551   : > { %v1056_v28 = vmul.f32 0.015625, %v1055_v27  ;;  %v1224_v27 = vld [vmem:[#allocation10 + $0x58] sm:$0xff] }
 0x553   : > { %v1057_v29 = vsub.f32 %v1053_v17, %v1056_v28  ;;  %v2100_v28 = vpack.c.bf16 %v1224_v27, %v1223_v26  ;;  %v1743_v26 = vld [vmem:[%s3257_s29] ss:$0 sm:$0xff]  ;;  %s3261_s29 = sld [smem:[#allocation35_spill]] }
 0x555   : > { %v1058_v30 = vmul.f32 %v3024_v42, %v1057_v29  ;;  %v1225_v29 = vld [vmem:[#allocation10 + $0x60] sm:$0xff] }
 0x557   : > { %v1059_v31 = vmul.f32 %v1058_v30, %v1058_v30 }
 0x559   : > { %1060 = vadd.xlane.f32.xlu0 %v1059_v31 }
 0x5e6   : > { %v1061_v48 = vpop.xlane.xlu0 %1060 }
 0x5e7   : > { %v1062_v49 = vmul.f32 0.015625, %v1061_v48 }
 0x5e9   : > { %v1063_v50 = vadd.f32 0.1, %v1062_v49 }
 0x5eb   : > { %2282 = vrsqrt.f32 %v1063_v50 }
 0x5f5   : > { %v2283_v51 = vpop.eup %2282 }
 0x5f6   : > { %v1065_v53 = vmul.f32 %v2283_v51, %v1058_v30  ;;  %v1226_v30 = vld [vmem:[#allocation10 + $0x68] sm:$0xff] }
 0x5f7   : > { %v2103_v31 = vpack.c.bf16 %v1226_v30, %v1225_v29 }
 0x5f8   : > { %v1073_v55 = vmul.f32 %v1735_v52, %v1065_v53 }
 0x5fa   : > { %v1081_v56 = vadd.f32 %v1736_v54, %v1073_v55 }
 0x5fc   : > { %1923 = vmatmul.mubr.f32.vlgmr.msra.gmra.mrb[2].mxu0 %v1081_v56  ;;  %v3068_v59 = vadd.f32 %v1081_v56, %v3038_v5  ;;  %v2088_v5 = vpack.c.bf16 %v1216_v11, %v1215_v8  ;;  %v1344_v56 = vld [vmem:[#allocation11 + $0x8] sm:$0xff]  ;;  %v1350_v8 = vld [vmem:[#allocation11 + $0x38] sm:$0xff]  ;;  %v1351_v11 = vld [vmem:[#allocation11 + $0x40] sm:$0xff] }
 0x5fd   : > { %1992 = vmatprep.mubr.msk.f32.mxu0 %vm2590_vm1, %v2591_v9  ;;  %v2118_v10 = vpack.c.bf16 %v1350_v8, %v1349_v7 }
 0x5fe   : > { %2089 = vmatpush3.bf16.msra.mxu1 %v2088_v5  ;;  %v1352_v5 = vld [vmem:[#allocation11 + $0x48] sm:$0xff] }
 0x5ff   : > { %2090 = vmatprep.subr.bf16.mxu1 %v2589_v6  ;;  %v2121_v12 = vpack.c.bf16 %v1352_v5, %v1351_v11 }
 0x602   : > { %2092 = vmatpush3.bf16.msra.mxu1 %v2091_v14  ;;  %v1354_v14 = vld [vmem:[#allocation11 + $0x58] sm:$0xff] }
 0x603   : > { %2093 = vmatprep.subr.bf16.mxu1 %v2589_v6 }
 0x606   : > { %2095 = vmatpush3.bf16.msra.mxu1 %v2094_v22 }
 0x607   : > { %2096 = vmatprep.subr.bf16.mxu1 %v2589_v6 }
 0x60a   : > { %2098 = vmatpush3.bf16.msra.mxu1 %v2097_v25 }
 0x60b   : > { %2099 = vmatprep.subr.bf16.mxu1 %v2589_v6 }
 0x60e   : > { %2101 = vmatpush3.bf16.msra.mxu1 %v2100_v28  ;;  %v1744_v28 = vld [vmem:[%s3258_s16] ss:$0 sm:$0xff]  ;;  %s3262_s16 = sld [smem:[#allocation36_spill]] }
 0x60f   : > { %2102 = vmatprep.subr.bf16.mxu1 %v2589_v6 }
 0x612   : > { %2104 = vmatpush3.bf16.msra.mxu1 %v2103_v31  ;;  %v1745_v31 = vld [vmem:[%s3259_s15] ss:$0 sm:$0xff]  ;;  %s1580_s15 = sshll.u32 %s812_s0, 4  ;;  %s3138_s15 = int_to_ptr.vmem [resolvable:$true] %s1580_s15 }
 0x613   : > { %2105 = vmatprep.subr.bf16.mxu1 %v2589_v6  ;;  %p2507_p13 = scmp.lt.s32.totalorder %s3138_s15, %s2505_s20 }
 0x616   : > { %2107 = vmatpush3.bf16.msra.mxu1 %v2106_v34 }
 0x617   : > { %2132 = vmatprep.subr.bf16.mxu1 %v2589_v6 }
 0x6cf   : > { %v1172_v58 = vpop.f32.mrb[2].mxu0 }
 0x6d0   : > { %v1173_v60 = vadd.f32 %v1737_v57, %v1172_v58  ;;  %v1924_v61 = vpop.f32.mrb[3].mxu0  ;;  %v1345_v57 = vld [vmem:[#allocation11 + $0x10] sm:$0xff] }
 0x6d1   : > { %v1347_v61 = vld [vmem:[#allocation11 + $0x20] sm:$0xff] }
 0x6d2   : > { %v1176_v62 = vadd.f32 %v1173_v60, %v3068_v59  ;;  %v1346_v60 = vld [vmem:[#allocation11 + $0x18] sm:$0xff] }
 0x6d4   : > { %v1738_v63 = vmul.f32 -1.442695, %v1176_v62 }
 0x6d6   : > { %2284 = vpow2.f32 %v1738_v63 }
 0x6e0   : > { %v2285_v0 = vpop.eup %2284 }
 0x6e1   : > { %v1180_v1 = vadd.f32 1.0, %v2285_v0 }
 0x6e3   : > { %2286 = vrcp.f32 %v1180_v1 }
 0x6ed   : > { %v2287_v2 = vpop.eup %2286 }
 0x6ee   : > { %v1183_v3 = vmul.f32 %v2287_v2, %v1176_v62  ;;  %v1348_v62 = vld [vmem:[#allocation11 + $0x28] sm:$0xff] }
 0x6ef   : > { %v2115_v63 = vpack.c.bf16 %v1348_v62, %v1347_v61  ;;  %v1482_v62 = vld [vmem:[#allocation13 + $0x50] sm:$0xff] }
 0x6f0   : > { %1184 = vadd.xlane.f32.xlu1 %v1183_v3 }
 0x77d   : > { %v1185_v15 = vpop.xlane.xlu1 %1184 }
 0x77e   : > { %v1186_v16 = vmul.f32 0.015625, %v1185_v15  ;;  %v2124_v15 = vpack.c.bf16 %v1354_v14, %v1353_v13  ;;  %v1748_v14 = vld [vmem:[%s3261_s29] ss:$0 sm:$0xff]  ;;  %s2500_s29 = scalar_lea.vmem %s3138_s15, 128 }
 0x77f   : > { %p2501_p6 = scmp.ne.s32.totalorder %s3138_s15, %s2500_s29  ;;  %p2508_p0 = scmp.lt.s32.totalorder %s2506_s9, %s2500_s29 }
 0x780   : > { %v1187_v17 = vsub.f32 %v1183_v3, %v1186_v16  ;;  %v1355_v16 = vld [vmem:[#allocation11 + $0x60] sm:$0xff] }
 0x781   : > { %p2502_p12 = pnand %p2501_p6, %p3264_p9  ;;  %p2509_p2 = por %p2508_p0, %p2507_p13 }
 0x782   : > { %v1188_v18 = vmul.f32 %v3024_v42, %v1187_v17  ;;  %v1356_v17 = vld [vmem:[#allocation11 + $0x68] sm:$0xff] }
 0x783   : > { %p2503_p1 = pneg %p2502_p12 }
 0x784   : > { %v1189_v19 = vmul.f32 %v1188_v18, %v1188_v18 }
 0x785   : > { %p2510_p3 = pnand %p2509_p2, %p2503_p1 }
 0x786   : > { %1190 = vadd.xlane.f32.xlu0 %v1189_v19  ;;  %v1357_v19 = vld [vmem:[#allocation11 + $0x70] sm:$0xff] }
 0x787   : > { %v2130_v21 = vpack.c.bf16 %v1358_v20, %v1357_v19 }
 0x813   : > { %v1191_v35 = vpop.xlane.xlu0 %1190 }
 0x814   : > { %v1192_v36 = vmul.f32 0.015625, %v1191_v35 }
 0x816   : > { %v1193_v37 = vadd.f32 0.1, %v1192_v36 }
 0x818   : > { %2288 = vrsqrt.f32 %v1193_v37 }
 0x822   : > { %v2289_v38 = vpop.eup %2288 }
 0x823   : > { %v1195_v40 = vmul.f32 %v2289_v38, %v1188_v18  ;;  %v2127_v18 = vpack.c.bf16 %v1356_v17, %v1355_v16 }
 0x825   : > { %v1203_v43 = vmul.f32 %v1739_v39, %v1195_v40 }
 0x827   : > { %v1211_v44 = vadd.f32 %v1740_v41, %v1203_v43  ;;  %v1472_v43 = vld [vmem:[#allocation13] sm:$0xff] }
 0x829   : > { %1958 = vmatmul.mubr.f32.vlgmr.msra.gmra.mrb[2].mxu1 %v1211_v44  ;;  %v3092_v47 = vadd.f32 %v1211_v44, %v3068_v59  ;;  %v2112_v59 = vpack.c.bf16 %v1346_v60, %v1345_v57  ;;  %v1473_v44 = vld [vmem:[#allocation13 + $0x8] sm:$0xff]  ;;  %v1479_v57 = vld [vmem:[#allocation13 + $0x38] sm:$0xff]  ;;  %v1480_v60 = vld [vmem:[#allocation13 + $0x40] sm:$0xff] }
 0x82a   : > { %2027 = vmatprep.mubr.msk.f32.mxu1 %vm2590_vm1, %v2591_v9  ;;  %v1343_v9 = vld [vmem:[#allocation11] sm:$0xff] }
 0x82b   : > { %v2109_v58 = vpack.c.bf16 %v1344_v56, %v1343_v9  ;;  %v1478_v56 = vld [vmem:[#allocation13 + $0x30] sm:$0xff] }
 0x82d   : > { %2110 = vmatpush3.bf16.msra.mxu0 %v2109_v58  ;;  %v2142_v58 = vpack.c.bf16 %v1479_v57, %v1478_v56 }
 0x82e   : > { %2111 = vmatprep.subr.bf16.mxu0 %v2589_v6 }
 0x831   : > { %2113 = vmatpush3.bf16.msra.mxu0 %v2112_v59  ;;  %v1481_v59 = vld [vmem:[#allocation13 + $0x48] sm:$0xff] }
 0x832   : > { %2114 = vmatprep.subr.bf16.mxu0 %v2589_v6  ;;  %v2145_v61 = vpack.c.bf16 %v1481_v59, %v1480_v60 }
 0x835   : > { %2116 = vmatpush3.bf16.msra.mxu0 %v2115_v63  ;;  %v1483_v63 = vld [vmem:[#allocation13 + $0x58] sm:$0xff] }
 0x836   : > { %2117 = vmatprep.subr.bf16.mxu0 %v2589_v6 }
 0x839   : > { %2119 = vmatpush3.bf16.msra.mxu0 %v2118_v10 }
 0x83a   : > { %2120 = vmatprep.subr.bf16.mxu0 %v2589_v6 }
 0x83d   : > { %2122 = vmatpush3.bf16.msra.mxu0 %v2121_v12  ;;  %v1747_v12 = vld [vmem:[%s3260_s22] ss:$0 sm:$0xff]  ;;  %s3263_s22 = sld [smem:[#allocation37_spill]] }
 0x83e   : > { %2123 = vmatprep.subr.bf16.mxu0 %v2589_v6 }
 0x841   : > { %2125 = vmatpush3.bf16.msra.mxu0 %v2124_v15 }
 0x842   : > { %2126 = vmatprep.subr.bf16.mxu0 %v2589_v6 }
 0x843   : > { %s3136_s1 = scalar_lea.hbm %s3263_s22, %s1751_s3 }
 0x845   : > { %2128 = vmatpush3.bf16.msra.mxu0 %v2127_v18 }
 0x846   : > { %2129 = vmatprep.subr.bf16.mxu0 %v2589_v6 }
 0x849   : > { %2131 = vmatpush3.bf16.msra.mxu0 %v2130_v21 }
 0x8fc   : > { %v1302_v46 = vpop.f32.mrb[2].mxu1 }
 0x8fd   : > { %v1303_v48 = vadd.f32 %v1741_v45, %v1302_v46  ;;  %v1959_v49 = vpop.f32.mrb[3].mxu1  ;;  %v1474_v45 = vld [vmem:[#allocation13 + $0x10] sm:$0xff]  ;;  %v2133_v46 = vpack.c.bf16 %v1473_v44, %v1472_v43 }
 0x8ff   : > { %v1306_v50 = vadd.f32 %v1303_v48, %v3092_v47  ;;  %v1475_v48 = vld [vmem:[#allocation13 + $0x18] sm:$0xff]  ;;  %2134 = vmatpush3.bf16.msra.mxu1 %v2133_v46 }
 0x900   : > { %v2136_v49 = vpack.c.bf16 %v1475_v48, %v1474_v45  ;;  %2135 = vmatprep.subr.bf16.mxu1 %v2589_v6 }
 0x901   : > { %v1742_v51 = vmul.f32 -1.442695, %v1306_v50 }
 0x903   : > { %2290 = vpow2.f32 %v1742_v51  ;;  %2137 = vmatpush3.bf16.msra.mxu1 %v2136_v49 }
 0x904   : > { %2138 = vmatprep.subr.bf16.mxu1 %v2589_v6 }
 0x90d   : > { %v2291_v52 = vpop.eup %2290 }
 0x90e   : > { %v1310_v53 = vadd.f32 1.0, %v2291_v52 }
 0x910   : > { %2292 = vrcp.f32 %v1310_v53 }
 0x91a   : > { %v2293_v54 = vpop.eup %2292 }
 0x91b   : > { %v1313_v55 = vmul.f32 %v2293_v54, %v1306_v50  ;;  %v1477_v50 = vld [vmem:[#allocation13 + $0x28] sm:$0xff] }
 0x91d   : > { %1314 = vadd.xlane.f32.xlu1 %v1313_v55 }
 0x9aa   : > { %v1315_v0 = vpop.xlane.xlu1 %1314 }
 0x9ab   : > { %v1316_v1 = vmul.f32 0.015625, %v1315_v0  ;;  %v2148_v0 = vpack.c.bf16 %v1483_v63, %v1482_v62 }
 0x9ad   : > { %v1317_v2 = vsub.f32 %v1313_v55, %v1316_v1  ;;  %v1484_v1 = vld [vmem:[#allocation13 + $0x60] sm:$0xff] }
 0x9af   : > { %v1318_v3 = vmul.f32 %v3024_v42, %v1317_v2  ;;  %v1485_v2 = vld [vmem:[#allocation13 + $0x68] sm:$0xff] }
 0x9b1   : > { %v1319_v4 = vmul.f32 %v1318_v3, %v1318_v3 }
 0x9b3   : > { %1320 = vadd.xlane.f32.xlu0 %v1319_v4  ;;  %v1487_v4 = vld [vmem:[#allocation13 + $0x78] sm:$0xff] }
 0xa40   : > { %v1321_v22 = vpop.xlane.xlu0 %1320 }
 0xa41   : > { %v1322_v23 = vmul.f32 0.015625, %v1321_v22 }
 0xa43   : > { %v1323_v24 = vadd.f32 0.1, %v1322_v23 }
 0xa45   : > { %2294 = vrsqrt.f32 %v1323_v24 }
 0xa4f   : > { %v2295_v25 = vpop.eup %2294 }
 0xa50   : > { %v1325_v27 = vmul.f32 %v2295_v25, %v1318_v3  ;;  %v1486_v3 = vld [vmem:[#allocation13 + $0x70] sm:$0xff] }
 0xa51   : > { %v2154_v7 = vpack.c.bf16 %v1487_v4, %v1486_v3 }
 0xa52   : > { %v1333_v29 = vmul.f32 %v1743_v26, %v1325_v27 }
 0xa54   : > { %v1341_v30 = vadd.f32 %v1744_v28, %v1333_v29 }
 0xa56   : > { %1993 = vmatmul.mubr.f32.vlgmr.msra.gmra.mrb[4].mxu0 %v1341_v30  ;;  %v1342_v33 = vadd.f32 %v1341_v30, %v3092_v47  ;;  %v1476_v47 = vld [vmem:[#allocation13 + $0x20] sm:$0xff] }
 0xa57   : > { %v2139_v51 = vpack.c.bf16 %v1477_v50, %v1476_v47 }
 0xa59   : > { %2140 = vmatpush3.bf16.msra.mxu1 %v2139_v51 }
 0xa5a   : > { %2141 = vmatprep.subr.bf16.mxu1 %v2589_v6 }
 0xa5d   : > { %2143 = vmatpush3.bf16.msra.mxu1 %v2142_v58 }
 0xa5e   : > { %2144 = vmatprep.subr.bf16.mxu1 %v2589_v6 }
 0xa61   : > { %2146 = vmatpush3.bf16.msra.mxu1 %v2145_v61 }
 0xa62   : > { %2147 = vmatprep.subr.bf16.mxu1 %v2589_v6 }
 0xa65   : > { %2149 = vmatpush3.bf16.msra.mxu1 %v2148_v0 }
 0xa66   : > { %2150 = vmatprep.subr.bf16.mxu1 %v2589_v6 }
 0xb29   : > { %v1432_v32 = vpop.f32.mrb[4].mxu0 }
 0xb2a   : > { %v1433_v34 = vadd.f32 %v1745_v31, %v1432_v32  ;;  %v1994_v35 = vpop.f32.mrb[5].mxu0 }
 0xb2c   : > { %v1436_v36 = vadd.f32 %v1433_v34, %v1342_v33 }
 0xb2e   : > { %v1746_v37 = vmul.f32 -1.442695, %v1436_v36 }
 0xb30   : > { %2296 = vpow2.f32 %v1746_v37 }
 0xb3a   : > { %v2297_v38 = vpop.eup %2296 }
 0xb3b   : > { %v1440_v39 = vadd.f32 1.0, %v2297_v38 }
 0xb3d   : > { %2298 = vrcp.f32 %v1440_v39 }
 0xb47   : > { %v2299_v40 = vpop.eup %2298 }
 0xb48   : > { %v1443_v41 = vmul.f32 %v2299_v40, %v1436_v36 }
 0xb4a   : > { %1444 = vadd.xlane.f32.xlu1 %v1443_v41 }
 0xbd7   : > { %v1445_v52 = vpop.xlane.xlu1 %1444 }
 0xbd8   : > { %v1446_v53 = vmul.f32 0.015625, %v1445_v52 }
 0xbda   : > { %v1447_v54 = vsub.f32 %v1443_v41, %v1446_v53 }
 0xbdc   : > { %v1448_v55 = vmul.f32 %v3024_v42, %v1447_v54  ;;  %v2151_v42 = vpack.c.bf16 %v1485_v2, %v1484_v1 }
 0xbde   : > { %v1449_v9 = vmul.f32 %v1448_v55, %v1448_v55  ;;  %2152 = vmatpush3.bf16.msra.mxu1 %v2151_v42 }
 0xbdf   : > { %2153 = vmatprep.subr.bf16.mxu1 %v2589_v6  ;;  %v1749_v6 = vld [vmem:[%s3262_s16] ss:$0 sm:$0xff] }
 0xbe0   : > { %1450 = vadd.xlane.f32.xlu0 %v1449_v9 }
 0xbe2   : > { %2155 = vmatpush3.bf16.msra.mxu1 %v2154_v7 }
 0xc6d   : > { %v1451_v8 = vpop.xlane.xlu0 %1450 }
 0xc6e   : > { %v1452_v10 = vmul.f32 0.015625, %v1451_v8 }
 0xc70   : > { %v1453_v11 = vadd.f32 0.1, %v1452_v10 }
 0xc72   : > { %2300 = vrsqrt.f32 %v1453_v11 }
 0xc7c   : > { %v2301_v5 = vpop.eup %2300 }
 0xc7d   : > { %v1455_v13 = vmul.f32 %v2301_v5, %v1448_v55 }
 0xc7f   : > { %v1463_v15 = vmul.f32 %v1747_v12, %v1455_v13 }
 0xc81   : > { %v1471_v16 = vadd.f32 %v1748_v14, %v1463_v15 }
 0xc83   : > { %2028 = vmatmul.mubr.f32.vlgmr.msra.gmra.mrb[4].mxu1 %v1471_v16 }
 0xd56   : > { %v1561_v17 = vpop.f32.mrb[4].mxu1 }
 0xd57   : > { %v1562_v18 = vadd.f32 %v1749_v6, %v1561_v17  ;;  %v2029_v19 = vpop.f32.mrb[5].mxu1 }
 0xd59   : > { %1565 = vst [vmem:[%s812_s0] sm:$0xff] %v1562_v18 }
 0xd5a   : > { %2513 = shalt.err (!%p2510_p3)
}
 0xd5b   : > { %s2514_s13 = scalar_lea.hbm %s3136_s1, 128  ;;  %s2518_s3 = scalar_lea.hbm %s3263_s22, 256 }
 0xd5c   : > { %p2515_p4 = scmp.ne.s32.totalorder %s3136_s1, %s2514_s13  ;;  %p2519_p8 = scmp.lt.u32.totalorder %s3136_s1, %s3263_s22 }
 0xd5d   : > { %p2520_p5 = scmp.lt.u32.totalorder %s2518_s3, %s2514_s13  ;;  %p2522_p6 = scmp.lt.u32.totalorder %s2514_s13, %s3136_s1 }
 0xd5e   : > { %p2516_p10 = pnand %p2515_p4, %p3264_p9 }
 0xd5f   : > { %p2521_p7 = por %p2520_p5, %p2519_p8 }
 0xd60   : > { %p2517_p11 = pneg %p2516_p10 }
 0xd61   : > { %p2523_p12 = por %p2522_p6, %p2521_p7 }
 0xd63   : > { %p2524_p1 = pnand %p2523_p12, %p2517_p11 }
 0xd65   : > { %2527 = shalt.err (!%p2524_p1)
}
 0xd66   : > { %2182 = dma.vmem_to_hbm [thread:$0]  (%p3264_p9), %s3138_s15, 128, %s3136_s1, %s1567_s7  }
 0xd67 PF: > { %s1592_s2 = sand.u32 1, %s2566_s4   ;;  %p3265_p13 = scmp.ne.s32.totalorder %s3241_s18, 0 }
 0xd68   : > { %p3266_p0 = scmp.ge.s32.totalorder %s2578_s25, 2  ;;  %s1593_s29 = scalar_lea.sflag [#allocation4], %s1592_s2 }
 0xd6a   : > { %p2208_p2 = pnand %p3266_p0, %p3265_p13 }
 0xd6c   : > { %2561 = dma.done.wait (!%p2208_p2), %s1593_s29, 128  }
 0xd6d   : > { %2563 = vsyncadd (!%p2208_p2), %s1593_s29, 4294967168  ;;  %p39_p3 = scmp.ge.s32.totalorder %s2907_s6, 4   ;;  %s3267_s4 = smov %s2570_s30 }
 0xd6e   : > { %s3268_s30 = smov %s2574_s24  ;;  %s3269_s24 = smov %s2918_s14 }
 0xd6f   : > { %s3270_s25 = smov %s2907_s6  ;;  %41 = sbr.rel (!%p39_p3) target bundleno = 27 (0x1b), region = 181 }
 0xd76   :  { %1598 = vsyncpa [#allocation3], 1 }
 0xd77   :  { %1600 = vsyncpa [#allocation3 + $0x1], 1 }
 0xd78   :  { %1601 = vsyncpa [#allocation6], 1 }
 0xd79   :  { %1602 = vsyncpa [#allocation9], 1 }
 0xd7a   :  { %1603 = vsyncpa [#allocation12], 1 }
 0xd7b   :  { %1604 = vsyncpa [#allocation4], 1 }
 0xd7c   :  { %1606 = vsyncpa [#allocation4 + $0x1], 1 }

</bundles_post_ra>
